<compile_context>
chip_gen: v5e
topology: v5e:2x2
jax: 0.10.0
libtpu: 0.0.40
codegen_flags: <defaults>
</compile_context>

<pallas_src>
import jax
import jax.numpy as jnp
from jax.experimental import pallas as pl
from jax.experimental.pallas import tpu as pltpu

VOCAB = 21
V_PAD = 128          # lane-dense padded vocab (one-hot width & logits width)
B_PAD = 8            # batch padded to one full sublane tile


# ---------------------------------------------------------------------------
# Fused encoder + decoder kernel (single invocation, unrolled recurrences)
# ---------------------------------------------------------------------------
def fused_seq2seq_kernel(enc_tok_ref, dec_tok_ref,
                         e_tab_ref, e_whh_ref, e_bi_ref, e_bhn_ref,
                         d_tab_ref, d_wic_ref, d_whh_ref, d_bi_ref, d_bhn_ref,
                         w_out_ref, b_out_ref,
                         logits_ref, hfin_ref):
    f32 = jnp.float32
    B, H = hfin_ref.shape                  # B == B_PAD (8), H == 32
    Te = enc_tok_ref.shape[0]
    Td = dec_tok_ref.shape[0]
    H2 = 2 * H

    def onehot(tok):                       # (T, B) int32 -> (T*B, V_PAD) f32
        T = tok.shape[0]
        lanes = jax.lax.broadcasted_iota(jnp.int32, (T, B, V_PAD), 2)
        return (tok[:, :, None] == lanes).astype(f32).reshape(T * B, V_PAD)

    # --------------------------- encoder -----------------------------------
    # Embedding + packed input projection fused: one (Te*B,128)x(128,96) GEMM.
    # e_bi = [b_ir+b_hr | b_iz+b_hz | b_in]; b_hn stays inside the r*(...) term.
    gi_e = jnp.dot(onehot(enc_tok_ref[...]), e_tab_ref[...],
                   preferred_element_type=f32) + e_bi_ref[...]      # (Te*B, 3H)
    e_whh = e_whh_ref[...]                                          # (H, 3H)
    e_bhn = e_bhn_ref[...]                                          # (1, H)

    h = jnp.zeros((B, H), f32)
    for t in range(Te):                    # static trip count -> fully unrolled
        gi = gi_e[t * B:(t + 1) * B]                     # 8-aligned (8, 3H)
        gh = jnp.dot(h, e_whh, preferred_element_type=f32)   # ONE dot / step
        rz = jax.nn.sigmoid(gi[:, :H2] + gh[:, :H2])          # packed r|z
        r, z = rz[:, :H], rz[:, H:]
        n = jnp.tanh(gi[:, H2:] + r * (gh[:, H2:] + e_bhn))
        h = (1.0 - z) * n + z * h
    h_enc = h                              # encoder final hidden state (B, H)

    # --------------------------- decoder -----------------------------------
    # Time-invariant context projection, packed: one (B,H)x(H,3H) GEMM.
    ctx = jnp.dot(h_enc, d_wic_ref[...], preferred_element_type=f32)  # (B, 3H)
    gi_d = jnp.dot(onehot(dec_tok_ref[...]), d_tab_ref[...],
                   preferred_element_type=f32) + d_bi_ref[...]        # (Td*B, 3H)
    d_whh = d_whh_ref[...]
    d_bhn = d_bhn_ref[...]

    h = h_enc                              # decoder init_state = encoder state
    hs = []                                # hidden states stay in vregs
    for t in range(Td):
        gi = gi_d[t * B:(t + 1) * B] + ctx
        gh = jnp.dot(h, d_whh, preferred_element_type=f32)
        rz = jax.nn.sigmoid(gi[:, :H2] + gh[:, :H2])
        r, z = rz[:, :H], rz[:, H:]
        n = jnp.tanh(gi[:, H2:] + r * (gh[:, H2:] + d_bhn))
        h = (1.0 - z) * n + z * h
        hs.append(h)

    hfin_ref[...] = h                      # final state written exactly once

    # Output projection: single lane-dense (Td*B, H) x (H, 128) GEMM + bias.
    hs_all = jnp.concatenate(hs, axis=0)                           # (Td*B, H)
    logits_ref[...] = (jnp.dot(hs_all, w_out_ref[...],
                               preferred_element_type=f32) + b_out_ref[...])


# ---------------------------------------------------------------------------
# pallas_call wrapper
# ---------------------------------------------------------------------------
def _full_spec(shape):
    nd = len(shape)
    return pl.BlockSpec(shape, lambda *_: (0,) * nd)


def run_fused_seq2seq(enc_tok, dec_tok, params, Td):
    H = params["e_whh"].shape[0]
    TdB = Td * B_PAD
    ins = (enc_tok, dec_tok,
           params["e_tab"], params["e_whh"], params["e_bi"], params["e_bhn"],
           params["d_tab"], params["d_wic"], params["d_whh"],
           params["d_bi"], params["d_bhn"],
           params["w_out"], params["b_out"])
    return pl.pallas_call(
        fused_seq2seq_kernel,
        out_shape=(jax.ShapeDtypeStruct((TdB, V_PAD), jnp.float32),
                   jax.ShapeDtypeStruct((B_PAD, H), jnp.float32)),
        grid_spec=pltpu.PrefetchScalarGridSpec(
            num_scalar_prefetch=0,
            grid=(1,),
            in_specs=[_full_spec(a.shape) for a in ins],
            out_specs=[_full_spec((TdB, V_PAD)), _full_spec((B_PAD, H))],
        ),
        compiler_params=pltpu.CompilerParams(
            dimension_semantics=("arbitrary",)),
    )(*ins)


# ---------------------------------------------------------------------------
# Parameters (packed per-gate layout [r|z|n]) + full forward
# ---------------------------------------------------------------------------
def init_params(key, vocab=VOCAB, E=16, H=32, v_pad=V_PAD):
    ks = jax.random.split(key, 13)
    s = 1.0 / float(H) ** 0.5
    u = lambda k, shp: jax.random.uniform(k, shp, jnp.float32, -s, s)

    enc_emb = jax.random.normal(ks[0], (vocab, E), jnp.float32) * 0.1
    dec_emb = jax.random.normal(ks[1], (vocab, E), jnp.float32) * 0.1

    # encoder GRU (gates packed along output dim: [r | z | n])
    e_wih = u(ks[2], (E, 3 * H))
    e_whh = u(ks[3], (H, 3 * H))
    e_bih = u(ks[4], (1, 3 * H))
    e_bhh = u(ks[5], (1, 3 * H))

    # decoder GRU: input = [embed ; context] -> split W_ih into E-part / H-part
    d_wix = u(ks[6], (E, 3 * H))
    d_wic = u(ks[7], (H, 3 * H))
    d_whh = u(ks[8], (H, 3 * H))
    d_bih = u(ks[9], (1, 3 * H))
    d_bhh = u(ks[10], (1, 3 * H))

    dense_w = u(ks[11], (H, vocab))
    dense_b = u(ks[12], (1, vocab))

    def pack_bias(bih, bhh):
        # gi bias: [b_ir + b_hr | b_iz + b_hz | b_in];  b_hn kept separate
        bi = jnp.concatenate([bih[:, :2 * H] + bhh[:, :2 * H], bih[:, 2 * H:]],
                             axis=1)
        return bi, bhh[:, 2 * H:]

    e_bi, e_bhn = pack_bias(e_bih, e_bhh)
    d_bi, d_bhn = pack_bias(d_bih, d_bhh)

    def tok_table(emb, wih):
        # Fuse embedding lookup with the packed input projection:
        # one-hot(tok) @ (emb @ W_ih)  ==  embedding(tok) @ W_ih   (exact)
        tab = jnp.dot(emb, wih)                                    # (vocab, 3H)
        return jnp.zeros((v_pad, 3 * H), jnp.float32).at[:vocab].set(tab)

    w_out = jnp.zeros((H, v_pad), jnp.float32).at[:, :vocab].set(dense_w)
    b_out = jnp.zeros((1, v_pad), jnp.float32).at[:, :vocab].set(dense_b)

    return dict(
        e_tab=tok_table(enc_emb, e_wih), e_whh=e_whh, e_bi=e_bi, e_bhn=e_bhn,
        d_tab=tok_table(dec_emb, d_wix), d_wic=d_wic, d_whh=d_whh,
        d_bi=d_bi, d_bhn=d_bhn,
        w_out=w_out, b_out=b_out,
    )


@jax.jit
def encoder_decoder_forward(params, enc_X, dec_X):
    B, Te = enc_X.shape
    _, Td = dec_X.shape
    H = params["e_whh"].shape[0]

    # Only glue left outside the kernel: tiny int32 transpose + batch pad.
    enc_tok = jnp.zeros((Te, B_PAD), jnp.int32).at[:, :B].set(
        enc_X.T.astype(jnp.int32))
    dec_tok = jnp.zeros((Td, B_PAD), jnp.int32).at[:, :B].set(
        dec_X.T.astype(jnp.int32))

    logits_flat, h_fin = run_fused_seq2seq(enc_tok, dec_tok, params, Td)

    logits = logits_flat.reshape(Td, B_PAD, V_PAD)[:, :B, :VOCAB]   # unpad
    output = jnp.transpose(logits, (1, 0, 2))                       # (B, Td, V)
    return output, h_fin[:B][None]                                  # (1, B, H)


if __name__ == "__main__":
    key = jax.random.PRNGKey(0)
    k_param, k_enc, k_dec = jax.random.split(key, 3)

    B, Te, Td, E, H = 2, 8, 8, 16, 32
    params = init_params(k_param, vocab=VOCAB, E=E, H=H)

    enc_X = jax.random.randint(k_enc, (B, Te), 0, VOCAB, dtype=jnp.int32)
    dec_X = jax.random.randint(k_dec, (B, Td), 0, VOCAB, dtype=jnp.int32)

    # mirror: assert torch.Tensor.max(enc_X).item() < 21 (and dec_X)
    assert int(jnp.max(enc_X)) < 21
    assert int(jnp.max(dec_X)) < 21

    output, state = encoder_decoder_forward(params, enc_X, dec_X)
    jax.block_until_ready((output, state))

    assert output.shape == (B, Td, VOCAB)
    assert state.shape == (1, B, H)
    assert bool(jnp.all(jnp.isfinite(output)))
    assert bool(jnp.all(jnp.isfinite(state)))
    print("KERNEL_OK")
</pallas_src>

<mosaic_0001>
module attributes {stable_mosaic.version = 11 : i64} {
  func.func @fused_seq2seq_kernel(%arg0: i32, %arg1: memref<8x8xi32, #tpu.memory_space<vmem>>, %arg2: memref<8x8xi32, #tpu.memory_space<vmem>>, %arg3: memref<128x96xf32, #tpu.memory_space<vmem>>, %arg4: memref<32x96xf32, #tpu.memory_space<vmem>>, %arg5: memref<1x96xf32, #tpu.memory_space<vmem>>, %arg6: memref<1x32xf32, #tpu.memory_space<vmem>>, %arg7: memref<128x96xf32, #tpu.memory_space<vmem>>, %arg8: memref<32x96xf32, #tpu.memory_space<vmem>>, %arg9: memref<32x96xf32, #tpu.memory_space<vmem>>, %arg10: memref<1x96xf32, #tpu.memory_space<vmem>>, %arg11: memref<1x32xf32, #tpu.memory_space<vmem>>, %arg12: memref<32x128xf32, #tpu.memory_space<vmem>>, %arg13: memref<1x128xf32, #tpu.memory_space<vmem>>, %arg14: memref<64x128xf32, #tpu.memory_space<vmem>>, %arg15: memref<8x32xf32, #tpu.memory_space<vmem>>) attributes {dimension_semantics = [#tpu.dimension_semantics<arbitrary>], iteration_bounds = array<i64: 1>, scalar_prefetch = 0 : i64, scratch_operands = 0 : i64, tpu.core_type = #tpu.core_type<tc>, window_params = [{pipeline_mode = #tpu.pipeline_mode<synchronous>, transform_indices = @transform_0, window_bounds = array<i64: 8, 8>}, {pipeline_mode = #tpu.pipeline_mode<synchronous>, transform_indices = @transform_1, window_bounds = array<i64: 8, 8>}, {pipeline_mode = #tpu.pipeline_mode<synchronous>, transform_indices = @transform_2, window_bounds = array<i64: 128, 96>}, {pipeline_mode = #tpu.pipeline_mode<synchronous>, transform_indices = @transform_3, window_bounds = array<i64: 32, 96>}, {pipeline_mode = #tpu.pipeline_mode<synchronous>, transform_indices = @transform_4, window_bounds = array<i64: 1, 96>}, {pipeline_mode = #tpu.pipeline_mode<synchronous>, transform_indices = @transform_5, window_bounds = array<i64: 1, 32>}, {pipeline_mode = #tpu.pipeline_mode<synchronous>, transform_indices = @transform_6, window_bounds = array<i64: 128, 96>}, {pipeline_mode = #tpu.pipeline_mode<synchronous>, transform_indices = @transform_7, window_bounds = array<i64: 32, 96>}, {pipeline_mode = #tpu.pipeline_mode<synchronous>, transform_indices = @transform_8, window_bounds = array<i64: 32, 96>}, {pipeline_mode = #tpu.pipeline_mode<synchronous>, transform_indices = @transform_9, window_bounds = array<i64: 1, 96>}, {pipeline_mode = #tpu.pipeline_mode<synchronous>, transform_indices = @transform_10, window_bounds = array<i64: 1, 32>}, {pipeline_mode = #tpu.pipeline_mode<synchronous>, transform_indices = @transform_11, window_bounds = array<i64: 32, 128>}, {pipeline_mode = #tpu.pipeline_mode<synchronous>, transform_indices = @transform_12, window_bounds = array<i64: 1, 128>}, {pipeline_mode = #tpu.pipeline_mode<synchronous>, transform_indices = @transform_13, window_bounds = array<i64: 64, 128>}, {pipeline_mode = #tpu.pipeline_mode<synchronous>, transform_indices = @transform_14, window_bounds = array<i64: 8, 32>}]} {
    %c0 = arith.constant 0 : index
    %c0_0 = arith.constant 0 : index
    %0 = vector.load %arg1[%c0, %c0_0] : memref<8x8xi32, #tpu.memory_space<vmem>>, vector<8x8xi32>
    %1 = tpu.iota {dimensions = array<i32: 2>} : vector<8x8x128xi32>
    %2 = vector.shape_cast %0 : vector<8x8xi32> to vector<8x8x1xi32>
    %3 = vector.broadcast %2 : vector<8x8x1xi32> to vector<8x8x128xi32>
    %4 = arith.cmpi eq, %3, %1 : vector<8x8x128xi32>
    %5 = arith.extui %4 : vector<8x8x128xi1> to vector<8x8x128xi32>
    %6 = arith.sitofp %5 : vector<8x8x128xi32> to vector<8x8x128xf32>
    %7 = vector.shape_cast %6 : vector<8x8x128xf32> to vector<64x128xf32>
    %c0_1 = arith.constant 0 : index
    %c0_2 = arith.constant 0 : index
    %8 = vector.load %arg3[%c0_1, %c0_2] : memref<128x96xf32, #tpu.memory_space<vmem>>, vector<128x96xf32>
    %cst = arith.constant dense<0.000000e+00> : vector<64x96xf32>
    %9 = tpu.matmul %7, %8, %cst {dimension_numbers = #tpu.dot_dimension_numbers<[1], [0], [0], [1], [0, 0, 1, 1], [], []>} : vector<64x128xf32>, vector<128x96xf32>, vector<64x96xf32> -> vector<64x96xf32>
    %c0_3 = arith.constant 0 : index
    %c0_4 = arith.constant 0 : index
    %10 = vector.load %arg5[%c0_3, %c0_4] : memref<1x96xf32, #tpu.memory_space<vmem>>, vector<1x96xf32>
    %11 = vector.broadcast %10 : vector<1x96xf32> to vector<64x96xf32>
    %12 = arith.addf %9, %11 : vector<64x96xf32>
    %c0_5 = arith.constant 0 : index
    %c0_6 = arith.constant 0 : index
    %13 = vector.load %arg4[%c0_5, %c0_6] : memref<32x96xf32, #tpu.memory_space<vmem>>, vector<32x96xf32>
    %c0_7 = arith.constant 0 : index
    %c0_8 = arith.constant 0 : index
    %14 = vector.load %arg6[%c0_7, %c0_8] : memref<1x32xf32, #tpu.memory_space<vmem>>, vector<1x32xf32>
    %cst_9 = arith.constant 0.000000e+00 : f32
    %15 = vector.broadcast %cst_9 : f32 to vector<8x32xf32>
    %16 = vector.extract_strided_slice %12 {offsets = [0, 0], sizes = [8, 96], strides = [1, 1]} : vector<64x96xf32> to vector<8x96xf32>
    %cst_10 = arith.constant dense<0.000000e+00> : vector<8x96xf32>
    %17 = tpu.matmul %15, %13, %cst_10 {dimension_numbers = #tpu.dot_dimension_numbers<[1], [0], [0], [1], [0, 0, 1, 1], [], []>} : vector<8x32xf32>, vector<32x96xf32>, vector<8x96xf32> -> vector<8x96xf32>
    %18 = vector.extract_strided_slice %16 {offsets = [0, 0], sizes = [8, 64], strides = [1, 1]} : vector<8x96xf32> to vector<8x64xf32>
    %19 = vector.extract_strided_slice %17 {offsets = [0, 0], sizes = [8, 64], strides = [1, 1]} : vector<8x96xf32> to vector<8x64xf32>
    %20 = arith.addf %18, %19 : vector<8x64xf32>
    %21 = arith.negf %20 : vector<8x64xf32>
    %22 = math.exp %21 : vector<8x64xf32>
    %cst_11 = arith.constant 1.000000e+00 : f32
    %23 = vector.broadcast %cst_11 : f32 to vector<8x64xf32>
    %24 = arith.addf %23, %22 : vector<8x64xf32>
    %25 = arith.divf %23, %24 : vector<8x64xf32>
    %26 = vector.extract_strided_slice %25 {offsets = [0, 0], sizes = [8, 32], strides = [1, 1]} : vector<8x64xf32> to vector<8x32xf32>
    %27 = vector.extract_strided_slice %25 {offsets = [0, 32], sizes = [8, 32], strides = [1, 1]} : vector<8x64xf32> to vector<8x32xf32>
    %28 = vector.extract_strided_slice %16 {offsets = [0, 64], sizes = [8, 32], strides = [1, 1]} : vector<8x96xf32> to vector<8x32xf32>
    %29 = vector.extract_strided_slice %17 {offsets = [0, 64], sizes = [8, 32], strides = [1, 1]} : vector<8x96xf32> to vector<8x32xf32>
    %30 = vector.broadcast %14 : vector<1x32xf32> to vector<8x32xf32>
    %31 = arith.addf %29, %30 : vector<8x32xf32>
    %32 = arith.mulf %26, %31 : vector<8x32xf32>
    %33 = arith.addf %28, %32 : vector<8x32xf32>
    %34 = math.tanh %33 : vector<8x32xf32>
    %cst_12 = arith.constant 1.000000e+00 : f32
    %35 = vector.broadcast %cst_12 : f32 to vector<8x32xf32>
    %36 = arith.subf %35, %27 : vector<8x32xf32>
    %37 = arith.mulf %36, %34 : vector<8x32xf32>
    %38 = arith.mulf %27, %15 : vector<8x32xf32>
    %39 = arith.addf %37, %38 : vector<8x32xf32>
    %40 = vector.extract_strided_slice %12 {offsets = [8, 0], sizes = [8, 96], strides = [1, 1]} : vector<64x96xf32> to vector<8x96xf32>
    %cst_13 = arith.constant dense<0.000000e+00> : vector<8x96xf32>
    %41 = tpu.matmul %39, %13, %cst_13 {dimension_numbers = #tpu.dot_dimension_numbers<[1], [0], [0], [1], [0, 0, 1, 1], [], []>} : vector<8x32xf32>, vector<32x96xf32>, vector<8x96xf32> -> vector<8x96xf32>
    %42 = vector.extract_strided_slice %40 {offsets = [0, 0], sizes = [8, 64], strides = [1, 1]} : vector<8x96xf32> to vector<8x64xf32>
    %43 = vector.extract_strided_slice %41 {offsets = [0, 0], sizes = [8, 64], strides = [1, 1]} : vector<8x96xf32> to vector<8x64xf32>
    %44 = arith.addf %42, %43 : vector<8x64xf32>
    %45 = arith.negf %44 : vector<8x64xf32>
    %46 = math.exp %45 : vector<8x64xf32>
    %cst_14 = arith.constant 1.000000e+00 : f32
    %47 = vector.broadcast %cst_14 : f32 to vector<8x64xf32>
    %48 = arith.addf %47, %46 : vector<8x64xf32>
    %49 = arith.divf %47, %48 : vector<8x64xf32>
    %50 = vector.extract_strided_slice %49 {offsets = [0, 0], sizes = [8, 32], strides = [1, 1]} : vector<8x64xf32> to vector<8x32xf32>
    %51 = vector.extract_strided_slice %49 {offsets = [0, 32], sizes = [8, 32], strides = [1, 1]} : vector<8x64xf32> to vector<8x32xf32>
    %52 = vector.extract_strided_slice %40 {offsets = [0, 64], sizes = [8, 32], strides = [1, 1]} : vector<8x96xf32> to vector<8x32xf32>
    %53 = vector.extract_strided_slice %41 {offsets = [0, 64], sizes = [8, 32], strides = [1, 1]} : vector<8x96xf32> to vector<8x32xf32>
    %54 = vector.broadcast %14 : vector<1x32xf32> to vector<8x32xf32>
    %55 = arith.addf %53, %54 : vector<8x32xf32>
    %56 = arith.mulf %50, %55 : vector<8x32xf32>
    %57 = arith.addf %52, %56 : vector<8x32xf32>
    %58 = math.tanh %57 : vector<8x32xf32>
    %cst_15 = arith.constant 1.000000e+00 : f32
    %59 = vector.broadcast %cst_15 : f32 to vector<8x32xf32>
    %60 = arith.subf %59, %51 : vector<8x32xf32>
    %61 = arith.mulf %60, %58 : vector<8x32xf32>
    %62 = arith.mulf %51, %39 : vector<8x32xf32>
    %63 = arith.addf %61, %62 : vector<8x32xf32>
    %64 = vector.extract_strided_slice %12 {offsets = [16, 0], sizes = [8, 96], strides = [1, 1]} : vector<64x96xf32> to vector<8x96xf32>
    %cst_16 = arith.constant dense<0.000000e+00> : vector<8x96xf32>
    %65 = tpu.matmul %63, %13, %cst_16 {dimension_numbers = #tpu.dot_dimension_numbers<[1], [0], [0], [1], [0, 0, 1, 1], [], []>} : vector<8x32xf32>, vector<32x96xf32>, vector<8x96xf32> -> vector<8x96xf32>
    %66 = vector.extract_strided_slice %64 {offsets = [0, 0], sizes = [8, 64], strides = [1, 1]} : vector<8x96xf32> to vector<8x64xf32>
    %67 = vector.extract_strided_slice %65 {offsets = [0, 0], sizes = [8, 64], strides = [1, 1]} : vector<8x96xf32> to vector<8x64xf32>
    %68 = arith.addf %66, %67 : vector<8x64xf32>
    %69 = arith.negf %68 : vector<8x64xf32>
    %70 = math.exp %69 : vector<8x64xf32>
    %cst_17 = arith.constant 1.000000e+00 : f32
    %71 = vector.broadcast %cst_17 : f32 to vector<8x64xf32>
    %72 = arith.addf %71, %70 : vector<8x64xf32>
    %73 = arith.divf %71, %72 : vector<8x64xf32>
    %74 = vector.extract_strided_slice %73 {offsets = [0, 0], sizes = [8, 32], strides = [1, 1]} : vector<8x64xf32> to vector<8x32xf32>
    %75 = vector.extract_strided_slice %73 {offsets = [0, 32], sizes = [8, 32], strides = [1, 1]} : vector<8x64xf32> to vector<8x32xf32>
    %76 = vector.extract_strided_slice %64 {offsets = [0, 64], sizes = [8, 32], strides = [1, 1]} : vector<8x96xf32> to vector<8x32xf32>
    %77 = vector.extract_strided_slice %65 {offsets = [0, 64], sizes = [8, 32], strides = [1, 1]} : vector<8x96xf32> to vector<8x32xf32>
    %78 = vector.broadcast %14 : vector<1x32xf32> to vector<8x32xf32>
    %79 = arith.addf %77, %78 : vector<8x32xf32>
    %80 = arith.mulf %74, %79 : vector<8x32xf32>
    %81 = arith.addf %76, %80 : vector<8x32xf32>
    %82 = math.tanh %81 : vector<8x32xf32>
    %cst_18 = arith.constant 1.000000e+00 : f32
    %83 = vector.broadcast %cst_18 : f32 to vector<8x32xf32>
    %84 = arith.subf %83, %75 : vector<8x32xf32>
    %85 = arith.mulf %84, %82 : vector<8x32xf32>
    %86 = arith.mulf %75, %63 : vector<8x32xf32>
    %87 = arith.addf %85, %86 : vector<8x32xf32>
    %88 = vector.extract_strided_slice %12 {offsets = [24, 0], sizes = [8, 96], strides = [1, 1]} : vector<64x96xf32> to vector<8x96xf32>
    %cst_19 = arith.constant dense<0.000000e+00> : vector<8x96xf32>
    %89 = tpu.matmul %87, %13, %cst_19 {dimension_numbers = #tpu.dot_dimension_numbers<[1], [0], [0], [1], [0, 0, 1, 1], [], []>} : vector<8x32xf32>, vector<32x96xf32>, vector<8x96xf32> -> vector<8x96xf32>
    %90 = vector.extract_strided_slice %88 {offsets = [0, 0], sizes = [8, 64], strides = [1, 1]} : vector<8x96xf32> to vector<8x64xf32>
    %91 = vector.extract_strided_slice %89 {offsets = [0, 0], sizes = [8, 64], strides = [1, 1]} : vector<8x96xf32> to vector<8x64xf32>
    %92 = arith.addf %90, %91 : vector<8x64xf32>
    %93 = arith.negf %92 : vector<8x64xf32>
    %94 = math.exp %93 : vector<8x64xf32>
    %cst_20 = arith.constant 1.000000e+00 : f32
    %95 = vector.broadcast %cst_20 : f32 to vector<8x64xf32>
    %96 = arith.addf %95, %94 : vector<8x64xf32>
    %97 = arith.divf %95, %96 : vector<8x64xf32>
    %98 = vector.extract_strided_slice %97 {offsets = [0, 0], sizes = [8, 32], strides = [1, 1]} : vector<8x64xf32> to vector<8x32xf32>
    %99 = vector.extract_strided_slice %97 {offsets = [0, 32], sizes = [8, 32], strides = [1, 1]} : vector<8x64xf32> to vector<8x32xf32>
    %100 = vector.extract_strided_slice %88 {offsets = [0, 64], sizes = [8, 32], strides = [1, 1]} : vector<8x96xf32> to vector<8x32xf32>
    %101 = vector.extract_strided_slice %89 {offsets = [0, 64], sizes = [8, 32], strides = [1, 1]} : vector<8x96xf32> to vector<8x32xf32>
    %102 = vector.broadcast %14 : vector<1x32xf32> to vector<8x32xf32>
    %103 = arith.addf %101, %102 : vector<8x32xf32>
    %104 = arith.mulf %98, %103 : vector<8x32xf32>
    %105 = arith.addf %100, %104 : vector<8x32xf32>
    %106 = math.tanh %105 : vector<8x32xf32>
    %cst_21 = arith.constant 1.000000e+00 : f32
    %107 = vector.broadcast %cst_21 : f32 to vector<8x32xf32>
    %108 = arith.subf %107, %99 : vector<8x32xf32>
    %109 = arith.mulf %108, %106 : vector<8x32xf32>
    %110 = arith.mulf %99, %87 : vector<8x32xf32>
    %111 = arith.addf %109, %110 : vector<8x32xf32>
    %112 = vector.extract_strided_slice %12 {offsets = [32, 0], sizes = [8, 96], strides = [1, 1]} : vector<64x96xf32> to vector<8x96xf32>
    %cst_22 = arith.constant dense<0.000000e+00> : vector<8x96xf32>
    %113 = tpu.matmul %111, %13, %cst_22 {dimension_numbers = #tpu.dot_dimension_numbers<[1], [0], [0], [1], [0, 0, 1, 1], [], []>} : vector<8x32xf32>, vector<32x96xf32>, vector<8x96xf32> -> vector<8x96xf32>
    %114 = vector.extract_strided_slice %112 {offsets = [0, 0], sizes = [8, 64], strides = [1, 1]} : vector<8x96xf32> to vector<8x64xf32>
    %115 = vector.extract_strided_slice %113 {offsets = [0, 0], sizes = [8, 64], strides = [1, 1]} : vector<8x96xf32> to vector<8x64xf32>
    %116 = arith.addf %114, %115 : vector<8x64xf32>
    %117 = arith.negf %116 : vector<8x64xf32>
    %118 = math.exp %117 : vector<8x64xf32>
    %cst_23 = arith.constant 1.000000e+00 : f32
    %119 = vector.broadcast %cst_23 : f32 to vector<8x64xf32>
    %120 = arith.addf %119, %118 : vector<8x64xf32>
    %121 = arith.divf %119, %120 : vector<8x64xf32>
    %122 = vector.extract_strided_slice %121 {offsets = [0, 0], sizes = [8, 32], strides = [1, 1]} : vector<8x64xf32> to vector<8x32xf32>
    %123 = vector.extract_strided_slice %121 {offsets = [0, 32], sizes = [8, 32], strides = [1, 1]} : vector<8x64xf32> to vector<8x32xf32>
    %124 = vector.extract_strided_slice %112 {offsets = [0, 64], sizes = [8, 32], strides = [1, 1]} : vector<8x96xf32> to vector<8x32xf32>
    %125 = vector.extract_strided_slice %113 {offsets = [0, 64], sizes = [8, 32], strides = [1, 1]} : vector<8x96xf32> to vector<8x32xf32>
    %126 = vector.broadcast %14 : vector<1x32xf32> to vector<8x32xf32>
    %127 = arith.addf %125, %126 : vector<8x32xf32>
    %128 = arith.mulf %122, %127 : vector<8x32xf32>
    %129 = arith.addf %124, %128 : vector<8x32xf32>
    %130 = math.tanh %129 : vector<8x32xf32>
    %cst_24 = arith.constant 1.000000e+00 : f32
    %131 = vector.broadcast %cst_24 : f32 to vector<8x32xf32>
    %132 = arith.subf %131, %123 : vector<8x32xf32>
    %133 = arith.mulf %132, %130 : vector<8x32xf32>
    %134 = arith.mulf %123, %111 : vector<8x32xf32>
    %135 = arith.addf %133, %134 : vector<8x32xf32>
    %136 = vector.extract_strided_slice %12 {offsets = [40, 0], sizes = [8, 96], strides = [1, 1]} : vector<64x96xf32> to vector<8x96xf32>
    %cst_25 = arith.constant dense<0.000000e+00> : vector<8x96xf32>
    %137 = tpu.matmul %135, %13, %cst_25 {dimension_numbers = #tpu.dot_dimension_numbers<[1], [0], [0], [1], [0, 0, 1, 1], [], []>} : vector<8x32xf32>, vector<32x96xf32>, vector<8x96xf32> -> vector<8x96xf32>
    %138 = vector.extract_strided_slice %136 {offsets = [0, 0], sizes = [8, 64], strides = [1, 1]} : vector<8x96xf32> to vector<8x64xf32>
    %139 = vector.extract_strided_slice %137 {offsets = [0, 0], sizes = [8, 64], strides = [1, 1]} : vector<8x96xf32> to vector<8x64xf32>
    %140 = arith.addf %138, %139 : vector<8x64xf32>
    %141 = arith.negf %140 : vector<8x64xf32>
    %142 = math.exp %141 : vector<8x64xf32>
    %cst_26 = arith.constant 1.000000e+00 : f32
    %143 = vector.broadcast %cst_26 : f32 to vector<8x64xf32>
    %144 = arith.addf %143, %142 : vector<8x64xf32>
    %145 = arith.divf %143, %144 : vector<8x64xf32>
    %146 = vector.extract_strided_slice %145 {offsets = [0, 0], sizes = [8, 32], strides = [1, 1]} : vector<8x64xf32> to vector<8x32xf32>
    %147 = vector.extract_strided_slice %145 {offsets = [0, 32], sizes = [8, 32], strides = [1, 1]} : vector<8x64xf32> to vector<8x32xf32>
    %148 = vector.extract_strided_slice %136 {offsets = [0, 64], sizes = [8, 32], strides = [1, 1]} : vector<8x96xf32> to vector<8x32xf32>
    %149 = vector.extract_strided_slice %137 {offsets = [0, 64], sizes = [8, 32], strides = [1, 1]} : vector<8x96xf32> to vector<8x32xf32>
    %150 = vector.broadcast %14 : vector<1x32xf32> to vector<8x32xf32>
    %151 = arith.addf %149, %150 : vector<8x32xf32>
    %152 = arith.mulf %146, %151 : vector<8x32xf32>
    %153 = arith.addf %148, %152 : vector<8x32xf32>
    %154 = math.tanh %153 : vector<8x32xf32>
    %cst_27 = arith.constant 1.000000e+00 : f32
    %155 = vector.broadcast %cst_27 : f32 to vector<8x32xf32>
    %156 = arith.subf %155, %147 : vector<8x32xf32>
    %157 = arith.mulf %156, %154 : vector<8x32xf32>
    %158 = arith.mulf %147, %135 : vector<8x32xf32>
    %159 = arith.addf %157, %158 : vector<8x32xf32>
    %160 = vector.extract_strided_slice %12 {offsets = [48, 0], sizes = [8, 96], strides = [1, 1]} : vector<64x96xf32> to vector<8x96xf32>
    %cst_28 = arith.constant dense<0.000000e+00> : vector<8x96xf32>
    %161 = tpu.matmul %159, %13, %cst_28 {dimension_numbers = #tpu.dot_dimension_numbers<[1], [0], [0], [1], [0, 0, 1, 1], [], []>} : vector<8x32xf32>, vector<32x96xf32>, vector<8x96xf32> -> vector<8x96xf32>
    %162 = vector.extract_strided_slice %160 {offsets = [0, 0], sizes = [8, 64], strides = [1, 1]} : vector<8x96xf32> to vector<8x64xf32>
    %163 = vector.extract_strided_slice %161 {offsets = [0, 0], sizes = [8, 64], strides = [1, 1]} : vector<8x96xf32> to vector<8x64xf32>
    %164 = arith.addf %162, %163 : vector<8x64xf32>
    %165 = arith.negf %164 : vector<8x64xf32>
    %166 = math.exp %165 : vector<8x64xf32>
    %cst_29 = arith.constant 1.000000e+00 : f32
    %167 = vector.broadcast %cst_29 : f32 to vector<8x64xf32>
    %168 = arith.addf %167, %166 : vector<8x64xf32>
    %169 = arith.divf %167, %168 : vector<8x64xf32>
    %170 = vector.extract_strided_slice %169 {offsets = [0, 0], sizes = [8, 32], strides = [1, 1]} : vector<8x64xf32> to vector<8x32xf32>
    %171 = vector.extract_strided_slice %169 {offsets = [0, 32], sizes = [8, 32], strides = [1, 1]} : vector<8x64xf32> to vector<8x32xf32>
    %172 = vector.extract_strided_slice %160 {offsets = [0, 64], sizes = [8, 32], strides = [1, 1]} : vector<8x96xf32> to vector<8x32xf32>
    %173 = vector.extract_strided_slice %161 {offsets = [0, 64], sizes = [8, 32], strides = [1, 1]} : vector<8x96xf32> to vector<8x32xf32>
    %174 = vector.broadcast %14 : vector<1x32xf32> to vector<8x32xf32>
    %175 = arith.addf %173, %174 : vector<8x32xf32>
    %176 = arith.mulf %170, %175 : vector<8x32xf32>
    %177 = arith.addf %172, %176 : vector<8x32xf32>
    %178 = math.tanh %177 : vector<8x32xf32>
    %cst_30 = arith.constant 1.000000e+00 : f32
    %179 = vector.broadcast %cst_30 : f32 to vector<8x32xf32>
    %180 = arith.subf %179, %171 : vector<8x32xf32>
    %181 = arith.mulf %180, %178 : vector<8x32xf32>
    %182 = arith.mulf %171, %159 : vector<8x32xf32>
    %183 = arith.addf %181, %182 : vector<8x32xf32>
    %184 = vector.extract_strided_slice %12 {offsets = [56, 0], sizes = [8, 96], strides = [1, 1]} : vector<64x96xf32> to vector<8x96xf32>
    %cst_31 = arith.constant dense<0.000000e+00> : vector<8x96xf32>
    %185 = tpu.matmul %183, %13, %cst_31 {dimension_numbers = #tpu.dot_dimension_numbers<[1], [0], [0], [1], [0, 0, 1, 1], [], []>} : vector<8x32xf32>, vector<32x96xf32>, vector<8x96xf32> -> vector<8x96xf32>
    %186 = vector.extract_strided_slice %184 {offsets = [0, 0], sizes = [8, 64], strides = [1, 1]} : vector<8x96xf32> to vector<8x64xf32>
    %187 = vector.extract_strided_slice %185 {offsets = [0, 0], sizes = [8, 64], strides = [1, 1]} : vector<8x96xf32> to vector<8x64xf32>
    %188 = arith.addf %186, %187 : vector<8x64xf32>
    %189 = arith.negf %188 : vector<8x64xf32>
    %190 = math.exp %189 : vector<8x64xf32>
    %cst_32 = arith.constant 1.000000e+00 : f32
    %191 = vector.broadcast %cst_32 : f32 to vector<8x64xf32>
    %192 = arith.addf %191, %190 : vector<8x64xf32>
    %193 = arith.divf %191, %192 : vector<8x64xf32>
    %194 = vector.extract_strided_slice %193 {offsets = [0, 0], sizes = [8, 32], strides = [1, 1]} : vector<8x64xf32> to vector<8x32xf32>
    %195 = vector.extract_strided_slice %193 {offsets = [0, 32], sizes = [8, 32], strides = [1, 1]} : vector<8x64xf32> to vector<8x32xf32>
    %196 = vector.extract_strided_slice %184 {offsets = [0, 64], sizes = [8, 32], strides = [1, 1]} : vector<8x96xf32> to vector<8x32xf32>
    %197 = vector.extract_strided_slice %185 {offsets = [0, 64], sizes = [8, 32], strides = [1, 1]} : vector<8x96xf32> to vector<8x32xf32>
    %198 = vector.broadcast %14 : vector<1x32xf32> to vector<8x32xf32>
    %199 = arith.addf %197, %198 : vector<8x32xf32>
    %200 = arith.mulf %194, %199 : vector<8x32xf32>
    %201 = arith.addf %196, %200 : vector<8x32xf32>
    %202 = math.tanh %201 : vector<8x32xf32>
    %cst_33 = arith.constant 1.000000e+00 : f32
    %203 = vector.broadcast %cst_33 : f32 to vector<8x32xf32>
    %204 = arith.subf %203, %195 : vector<8x32xf32>
    %205 = arith.mulf %204, %202 : vector<8x32xf32>
    %206 = arith.mulf %195, %183 : vector<8x32xf32>
    %207 = arith.addf %205, %206 : vector<8x32xf32>
    %c0_34 = arith.constant 0 : index
    %c0_35 = arith.constant 0 : index
    %208 = vector.load %arg8[%c0_34, %c0_35] : memref<32x96xf32, #tpu.memory_space<vmem>>, vector<32x96xf32>
    %cst_36 = arith.constant dense<0.000000e+00> : vector<8x96xf32>
    %209 = tpu.matmul %207, %208, %cst_36 {dimension_numbers = #tpu.dot_dimension_numbers<[1], [0], [0], [1], [0, 0, 1, 1], [], []>} : vector<8x32xf32>, vector<32x96xf32>, vector<8x96xf32> -> vector<8x96xf32>
    %c0_37 = arith.constant 0 : index
    %c0_38 = arith.constant 0 : index
    %210 = vector.load %arg2[%c0_37, %c0_38] : memref<8x8xi32, #tpu.memory_space<vmem>>, vector<8x8xi32>
    %211 = tpu.iota {dimensions = array<i32: 2>} : vector<8x8x128xi32>
    %212 = vector.shape_cast %210 : vector<8x8xi32> to vector<8x8x1xi32>
    %213 = vector.broadcast %212 : vector<8x8x1xi32> to vector<8x8x128xi32>
    %214 = arith.cmpi eq, %213, %211 : vector<8x8x128xi32>
    %215 = arith.extui %214 : vector<8x8x128xi1> to vector<8x8x128xi32>
    %216 = arith.sitofp %215 : vector<8x8x128xi32> to vector<8x8x128xf32>
    %217 = vector.shape_cast %216 : vector<8x8x128xf32> to vector<64x128xf32>
    %c0_39 = arith.constant 0 : index
    %c0_40 = arith.constant 0 : index
    %218 = vector.load %arg7[%c0_39, %c0_40] : memref<128x96xf32, #tpu.memory_space<vmem>>, vector<128x96xf32>
    %cst_41 = arith.constant dense<0.000000e+00> : vector<64x96xf32>
    %219 = tpu.matmul %217, %218, %cst_41 {dimension_numbers = #tpu.dot_dimension_numbers<[1], [0], [0], [1], [0, 0, 1, 1], [], []>} : vector<64x128xf32>, vector<128x96xf32>, vector<64x96xf32> -> vector<64x96xf32>
    %c0_42 = arith.constant 0 : index
    %c0_43 = arith.constant 0 : index
    %220 = vector.load %arg10[%c0_42, %c0_43] : memref<1x96xf32, #tpu.memory_space<vmem>>, vector<1x96xf32>
    %221 = vector.broadcast %220 : vector<1x96xf32> to vector<64x96xf32>
    %222 = arith.addf %219, %221 : vector<64x96xf32>
    %c0_44 = arith.constant 0 : index
    %c0_45 = arith.constant 0 : index
    %223 = vector.load %arg9[%c0_44, %c0_45] : memref<32x96xf32, #tpu.memory_space<vmem>>, vector<32x96xf32>
    %c0_46 = arith.constant 0 : index
    %c0_47 = arith.constant 0 : index
    %224 = vector.load %arg11[%c0_46, %c0_47] : memref<1x32xf32, #tpu.memory_space<vmem>>, vector<1x32xf32>
    %225 = vector.extract_strided_slice %222 {offsets = [0, 0], sizes = [8, 96], strides = [1, 1]} : vector<64x96xf32> to vector<8x96xf32>
    %226 = arith.addf %225, %209 : vector<8x96xf32>
    %cst_48 = arith.constant dense<0.000000e+00> : vector<8x96xf32>
    %227 = tpu.matmul %207, %223, %cst_48 {dimension_numbers = #tpu.dot_dimension_numbers<[1], [0], [0], [1], [0, 0, 1, 1], [], []>} : vector<8x32xf32>, vector<32x96xf32>, vector<8x96xf32> -> vector<8x96xf32>
    %228 = vector.extract_strided_slice %226 {offsets = [0, 0], sizes = [8, 64], strides = [1, 1]} : vector<8x96xf32> to vector<8x64xf32>
    %229 = vector.extract_strided_slice %227 {offsets = [0, 0], sizes = [8, 64], strides = [1, 1]} : vector<8x96xf32> to vector<8x64xf32>
    %230 = arith.addf %228, %229 : vector<8x64xf32>
    %231 = arith.negf %230 : vector<8x64xf32>
    %232 = math.exp %231 : vector<8x64xf32>
    %cst_49 = arith.constant 1.000000e+00 : f32
    %233 = vector.broadcast %cst_49 : f32 to vector<8x64xf32>
    %234 = arith.addf %233, %232 : vector<8x64xf32>
    %235 = arith.divf %233, %234 : vector<8x64xf32>
    %236 = vector.extract_strided_slice %235 {offsets = [0, 0], sizes = [8, 32], strides = [1, 1]} : vector<8x64xf32> to vector<8x32xf32>
    %237 = vector.extract_strided_slice %235 {offsets = [0, 32], sizes = [8, 32], strides = [1, 1]} : vector<8x64xf32> to vector<8x32xf32>
    %238 = vector.extract_strided_slice %226 {offsets = [0, 64], sizes = [8, 32], strides = [1, 1]} : vector<8x96xf32> to vector<8x32xf32>
    %239 = vector.extract_strided_slice %227 {offsets = [0, 64], sizes = [8, 32], strides = [1, 1]} : vector<8x96xf32> to vector<8x32xf32>
    %240 = vector.broadcast %224 : vector<1x32xf32> to vector<8x32xf32>
    %241 = arith.addf %239, %240 : vector<8x32xf32>
    %242 = arith.mulf %236, %241 : vector<8x32xf32>
    %243 = arith.addf %238, %242 : vector<8x32xf32>
    %244 = math.tanh %243 : vector<8x32xf32>
    %cst_50 = arith.constant 1.000000e+00 : f32
    %245 = vector.broadcast %cst_50 : f32 to vector<8x32xf32>
    %246 = arith.subf %245, %237 : vector<8x32xf32>
    %247 = arith.mulf %246, %244 : vector<8x32xf32>
    %248 = arith.mulf %237, %207 : vector<8x32xf32>
    %249 = arith.addf %247, %248 : vector<8x32xf32>
    %250 = vector.extract_strided_slice %222 {offsets = [8, 0], sizes = [8, 96], strides = [1, 1]} : vector<64x96xf32> to vector<8x96xf32>
    %251 = arith.addf %250, %209 : vector<8x96xf32>
    %cst_51 = arith.constant dense<0.000000e+00> : vector<8x96xf32>
    %252 = tpu.matmul %249, %223, %cst_51 {dimension_numbers = #tpu.dot_dimension_numbers<[1], [0], [0], [1], [0, 0, 1, 1], [], []>} : vector<8x32xf32>, vector<32x96xf32>, vector<8x96xf32> -> vector<8x96xf32>
    %253 = vector.extract_strided_slice %251 {offsets = [0, 0], sizes = [8, 64], strides = [1, 1]} : vector<8x96xf32> to vector<8x64xf32>
    %254 = vector.extract_strided_slice %252 {offsets = [0, 0], sizes = [8, 64], strides = [1, 1]} : vector<8x96xf32> to vector<8x64xf32>
    %255 = arith.addf %253, %254 : vector<8x64xf32>
    %256 = arith.negf %255 : vector<8x64xf32>
    %257 = math.exp %256 : vector<8x64xf32>
    %cst_52 = arith.constant 1.000000e+00 : f32
    %258 = vector.broadcast %cst_52 : f32 to vector<8x64xf32>
    %259 = arith.addf %258, %257 : vector<8x64xf32>
    %260 = arith.divf %258, %259 : vector<8x64xf32>
    %261 = vector.extract_strided_slice %260 {offsets = [0, 0], sizes = [8, 32], strides = [1, 1]} : vector<8x64xf32> to vector<8x32xf32>
    %262 = vector.extract_strided_slice %260 {offsets = [0, 32], sizes = [8, 32], strides = [1, 1]} : vector<8x64xf32> to vector<8x32xf32>
    %263 = vector.extract_strided_slice %251 {offsets = [0, 64], sizes = [8, 32], strides = [1, 1]} : vector<8x96xf32> to vector<8x32xf32>
    %264 = vector.extract_strided_slice %252 {offsets = [0, 64], sizes = [8, 32], strides = [1, 1]} : vector<8x96xf32> to vector<8x32xf32>
    %265 = vector.broadcast %224 : vector<1x32xf32> to vector<8x32xf32>
    %266 = arith.addf %264, %265 : vector<8x32xf32>
    %267 = arith.mulf %261, %266 : vector<8x32xf32>
    %268 = arith.addf %263, %267 : vector<8x32xf32>
    %269 = math.tanh %268 : vector<8x32xf32>
    %cst_53 = arith.constant 1.000000e+00 : f32
    %270 = vector.broadcast %cst_53 : f32 to vector<8x32xf32>
    %271 = arith.subf %270, %262 : vector<8x32xf32>
    %272 = arith.mulf %271, %269 : vector<8x32xf32>
    %273 = arith.mulf %262, %249 : vector<8x32xf32>
    %274 = arith.addf %272, %273 : vector<8x32xf32>
    %275 = vector.extract_strided_slice %222 {offsets = [16, 0], sizes = [8, 96], strides = [1, 1]} : vector<64x96xf32> to vector<8x96xf32>
    %276 = arith.addf %275, %209 : vector<8x96xf32>
    %cst_54 = arith.constant dense<0.000000e+00> : vector<8x96xf32>
    %277 = tpu.matmul %274, %223, %cst_54 {dimension_numbers = #tpu.dot_dimension_numbers<[1], [0], [0], [1], [0, 0, 1, 1], [], []>} : vector<8x32xf32>, vector<32x96xf32>, vector<8x96xf32> -> vector<8x96xf32>
    %278 = vector.extract_strided_slice %276 {offsets = [0, 0], sizes = [8, 64], strides = [1, 1]} : vector<8x96xf32> to vector<8x64xf32>
    %279 = vector.extract_strided_slice %277 {offsets = [0, 0], sizes = [8, 64], strides = [1, 1]} : vector<8x96xf32> to vector<8x64xf32>
    %280 = arith.addf %278, %279 : vector<8x64xf32>
    %281 = arith.negf %280 : vector<8x64xf32>
    %282 = math.exp %281 : vector<8x64xf32>
    %cst_55 = arith.constant 1.000000e+00 : f32
    %283 = vector.broadcast %cst_55 : f32 to vector<8x64xf32>
    %284 = arith.addf %283, %282 : vector<8x64xf32>
    %285 = arith.divf %283, %284 : vector<8x64xf32>
    %286 = vector.extract_strided_slice %285 {offsets = [0, 0], sizes = [8, 32], strides = [1, 1]} : vector<8x64xf32> to vector<8x32xf32>
    %287 = vector.extract_strided_slice %285 {offsets = [0, 32], sizes = [8, 32], strides = [1, 1]} : vector<8x64xf32> to vector<8x32xf32>
    %288 = vector.extract_strided_slice %276 {offsets = [0, 64], sizes = [8, 32], strides = [1, 1]} : vector<8x96xf32> to vector<8x32xf32>
    %289 = vector.extract_strided_slice %277 {offsets = [0, 64], sizes = [8, 32], strides = [1, 1]} : vector<8x96xf32> to vector<8x32xf32>
    %290 = vector.broadcast %224 : vector<1x32xf32> to vector<8x32xf32>
    %291 = arith.addf %289, %290 : vector<8x32xf32>
    %292 = arith.mulf %286, %291 : vector<8x32xf32>
    %293 = arith.addf %288, %292 : vector<8x32xf32>
    %294 = math.tanh %293 : vector<8x32xf32>
    %cst_56 = arith.constant 1.000000e+00 : f32
    %295 = vector.broadcast %cst_56 : f32 to vector<8x32xf32>
    %296 = arith.subf %295, %287 : vector<8x32xf32>
    %297 = arith.mulf %296, %294 : vector<8x32xf32>
    %298 = arith.mulf %287, %274 : vector<8x32xf32>
    %299 = arith.addf %297, %298 : vector<8x32xf32>
    %300 = vector.extract_strided_slice %222 {offsets = [24, 0], sizes = [8, 96], strides = [1, 1]} : vector<64x96xf32> to vector<8x96xf32>
    %301 = arith.addf %300, %209 : vector<8x96xf32>
    %cst_57 = arith.constant dense<0.000000e+00> : vector<8x96xf32>
    %302 = tpu.matmul %299, %223, %cst_57 {dimension_numbers = #tpu.dot_dimension_numbers<[1], [0], [0], [1], [0, 0, 1, 1], [], []>} : vector<8x32xf32>, vector<32x96xf32>, vector<8x96xf32> -> vector<8x96xf32>
    %303 = vector.extract_strided_slice %301 {offsets = [0, 0], sizes = [8, 64], strides = [1, 1]} : vector<8x96xf32> to vector<8x64xf32>
    %304 = vector.extract_strided_slice %302 {offsets = [0, 0], sizes = [8, 64], strides = [1, 1]} : vector<8x96xf32> to vector<8x64xf32>
    %305 = arith.addf %303, %304 : vector<8x64xf32>
    %306 = arith.negf %305 : vector<8x64xf32>
    %307 = math.exp %306 : vector<8x64xf32>
    %cst_58 = arith.constant 1.000000e+00 : f32
    %308 = vector.broadcast %cst_58 : f32 to vector<8x64xf32>
    %309 = arith.addf %308, %307 : vector<8x64xf32>
    %310 = arith.divf %308, %309 : vector<8x64xf32>
    %311 = vector.extract_strided_slice %310 {offsets = [0, 0], sizes = [8, 32], strides = [1, 1]} : vector<8x64xf32> to vector<8x32xf32>
    %312 = vector.extract_strided_slice %310 {offsets = [0, 32], sizes = [8, 32], strides = [1, 1]} : vector<8x64xf32> to vector<8x32xf32>
    %313 = vector.extract_strided_slice %301 {offsets = [0, 64], sizes = [8, 32], strides = [1, 1]} : vector<8x96xf32> to vector<8x32xf32>
    %314 = vector.extract_strided_slice %302 {offsets = [0, 64], sizes = [8, 32], strides = [1, 1]} : vector<8x96xf32> to vector<8x32xf32>
    %315 = vector.broadcast %224 : vector<1x32xf32> to vector<8x32xf32>
    %316 = arith.addf %314, %315 : vector<8x32xf32>
    %317 = arith.mulf %311, %316 : vector<8x32xf32>
    %318 = arith.addf %313, %317 : vector<8x32xf32>
    %319 = math.tanh %318 : vector<8x32xf32>
    %cst_59 = arith.constant 1.000000e+00 : f32
    %320 = vector.broadcast %cst_59 : f32 to vector<8x32xf32>
    %321 = arith.subf %320, %312 : vector<8x32xf32>
    %322 = arith.mulf %321, %319 : vector<8x32xf32>
    %323 = arith.mulf %312, %299 : vector<8x32xf32>
    %324 = arith.addf %322, %323 : vector<8x32xf32>
    %325 = vector.extract_strided_slice %222 {offsets = [32, 0], sizes = [8, 96], strides = [1, 1]} : vector<64x96xf32> to vector<8x96xf32>
    %326 = arith.addf %325, %209 : vector<8x96xf32>
    %cst_60 = arith.constant dense<0.000000e+00> : vector<8x96xf32>
    %327 = tpu.matmul %324, %223, %cst_60 {dimension_numbers = #tpu.dot_dimension_numbers<[1], [0], [0], [1], [0, 0, 1, 1], [], []>} : vector<8x32xf32>, vector<32x96xf32>, vector<8x96xf32> -> vector<8x96xf32>
    %328 = vector.extract_strided_slice %326 {offsets = [0, 0], sizes = [8, 64], strides = [1, 1]} : vector<8x96xf32> to vector<8x64xf32>
    %329 = vector.extract_strided_slice %327 {offsets = [0, 0], sizes = [8, 64], strides = [1, 1]} : vector<8x96xf32> to vector<8x64xf32>
    %330 = arith.addf %328, %329 : vector<8x64xf32>
    %331 = arith.negf %330 : vector<8x64xf32>
    %332 = math.exp %331 : vector<8x64xf32>
    %cst_61 = arith.constant 1.000000e+00 : f32
    %333 = vector.broadcast %cst_61 : f32 to vector<8x64xf32>
    %334 = arith.addf %333, %332 : vector<8x64xf32>
    %335 = arith.divf %333, %334 : vector<8x64xf32>
    %336 = vector.extract_strided_slice %335 {offsets = [0, 0], sizes = [8, 32], strides = [1, 1]} : vector<8x64xf32> to vector<8x32xf32>
    %337 = vector.extract_strided_slice %335 {offsets = [0, 32], sizes = [8, 32], strides = [1, 1]} : vector<8x64xf32> to vector<8x32xf32>
    %338 = vector.extract_strided_slice %326 {offsets = [0, 64], sizes = [8, 32], strides = [1, 1]} : vector<8x96xf32> to vector<8x32xf32>
    %339 = vector.extract_strided_slice %327 {offsets = [0, 64], sizes = [8, 32], strides = [1, 1]} : vector<8x96xf32> to vector<8x32xf32>
    %340 = vector.broadcast %224 : vector<1x32xf32> to vector<8x32xf32>
    %341 = arith.addf %339, %340 : vector<8x32xf32>
    %342 = arith.mulf %336, %341 : vector<8x32xf32>
    %343 = arith.addf %338, %342 : vector<8x32xf32>
    %344 = math.tanh %343 : vector<8x32xf32>
    %cst_62 = arith.constant 1.000000e+00 : f32
    %345 = vector.broadcast %cst_62 : f32 to vector<8x32xf32>
    %346 = arith.subf %345, %337 : vector<8x32xf32>
    %347 = arith.mulf %346, %344 : vector<8x32xf32>
    %348 = arith.mulf %337, %324 : vector<8x32xf32>
    %349 = arith.addf %347, %348 : vector<8x32xf32>
    %350 = vector.extract_strided_slice %222 {offsets = [40, 0], sizes = [8, 96], strides = [1, 1]} : vector<64x96xf32> to vector<8x96xf32>
    %351 = arith.addf %350, %209 : vector<8x96xf32>
    %cst_63 = arith.constant dense<0.000000e+00> : vector<8x96xf32>
    %352 = tpu.matmul %349, %223, %cst_63 {dimension_numbers = #tpu.dot_dimension_numbers<[1], [0], [0], [1], [0, 0, 1, 1], [], []>} : vector<8x32xf32>, vector<32x96xf32>, vector<8x96xf32> -> vector<8x96xf32>
    %353 = vector.extract_strided_slice %351 {offsets = [0, 0], sizes = [8, 64], strides = [1, 1]} : vector<8x96xf32> to vector<8x64xf32>
    %354 = vector.extract_strided_slice %352 {offsets = [0, 0], sizes = [8, 64], strides = [1, 1]} : vector<8x96xf32> to vector<8x64xf32>
    %355 = arith.addf %353, %354 : vector<8x64xf32>
    %356 = arith.negf %355 : vector<8x64xf32>
    %357 = math.exp %356 : vector<8x64xf32>
    %cst_64 = arith.constant 1.000000e+00 : f32
    %358 = vector.broadcast %cst_64 : f32 to vector<8x64xf32>
    %359 = arith.addf %358, %357 : vector<8x64xf32>
    %360 = arith.divf %358, %359 : vector<8x64xf32>
    %361 = vector.extract_strided_slice %360 {offsets = [0, 0], sizes = [8, 32], strides = [1, 1]} : vector<8x64xf32> to vector<8x32xf32>
    %362 = vector.extract_strided_slice %360 {offsets = [0, 32], sizes = [8, 32], strides = [1, 1]} : vector<8x64xf32> to vector<8x32xf32>
    %363 = vector.extract_strided_slice %351 {offsets = [0, 64], sizes = [8, 32], strides = [1, 1]} : vector<8x96xf32> to vector<8x32xf32>
    %364 = vector.extract_strided_slice %352 {offsets = [0, 64], sizes = [8, 32], strides = [1, 1]} : vector<8x96xf32> to vector<8x32xf32>
    %365 = vector.broadcast %224 : vector<1x32xf32> to vector<8x32xf32>
    %366 = arith.addf %364, %365 : vector<8x32xf32>
    %367 = arith.mulf %361, %366 : vector<8x32xf32>
    %368 = arith.addf %363, %367 : vector<8x32xf32>
    %369 = math.tanh %368 : vector<8x32xf32>
    %cst_65 = arith.constant 1.000000e+00 : f32
    %370 = vector.broadcast %cst_65 : f32 to vector<8x32xf32>
    %371 = arith.subf %370, %362 : vector<8x32xf32>
    %372 = arith.mulf %371, %369 : vector<8x32xf32>
    %373 = arith.mulf %362, %349 : vector<8x32xf32>
    %374 = arith.addf %372, %373 : vector<8x32xf32>
    %375 = vector.extract_strided_slice %222 {offsets = [48, 0], sizes = [8, 96], strides = [1, 1]} : vector<64x96xf32> to vector<8x96xf32>
    %376 = arith.addf %375, %209 : vector<8x96xf32>
    %cst_66 = arith.constant dense<0.000000e+00> : vector<8x96xf32>
    %377 = tpu.matmul %374, %223, %cst_66 {dimension_numbers = #tpu.dot_dimension_numbers<[1], [0], [0], [1], [0, 0, 1, 1], [], []>} : vector<8x32xf32>, vector<32x96xf32>, vector<8x96xf32> -> vector<8x96xf32>
    %378 = vector.extract_strided_slice %376 {offsets = [0, 0], sizes = [8, 64], strides = [1, 1]} : vector<8x96xf32> to vector<8x64xf32>
    %379 = vector.extract_strided_slice %377 {offsets = [0, 0], sizes = [8, 64], strides = [1, 1]} : vector<8x96xf32> to vector<8x64xf32>
    %380 = arith.addf %378, %379 : vector<8x64xf32>
    %381 = arith.negf %380 : vector<8x64xf32>
    %382 = math.exp %381 : vector<8x64xf32>
    %cst_67 = arith.constant 1.000000e+00 : f32
    %383 = vector.broadcast %cst_67 : f32 to vector<8x64xf32>
    %384 = arith.addf %383, %382 : vector<8x64xf32>
    %385 = arith.divf %383, %384 : vector<8x64xf32>
    %386 = vector.extract_strided_slice %385 {offsets = [0, 0], sizes = [8, 32], strides = [1, 1]} : vector<8x64xf32> to vector<8x32xf32>
    %387 = vector.extract_strided_slice %385 {offsets = [0, 32], sizes = [8, 32], strides = [1, 1]} : vector<8x64xf32> to vector<8x32xf32>
    %388 = vector.extract_strided_slice %376 {offsets = [0, 64], sizes = [8, 32], strides = [1, 1]} : vector<8x96xf32> to vector<8x32xf32>
    %389 = vector.extract_strided_slice %377 {offsets = [0, 64], sizes = [8, 32], strides = [1, 1]} : vector<8x96xf32> to vector<8x32xf32>
    %390 = vector.broadcast %224 : vector<1x32xf32> to vector<8x32xf32>
    %391 = arith.addf %389, %390 : vector<8x32xf32>
    %392 = arith.mulf %386, %391 : vector<8x32xf32>
    %393 = arith.addf %388, %392 : vector<8x32xf32>
    %394 = math.tanh %393 : vector<8x32xf32>
    %cst_68 = arith.constant 1.000000e+00 : f32
    %395 = vector.broadcast %cst_68 : f32 to vector<8x32xf32>
    %396 = arith.subf %395, %387 : vector<8x32xf32>
    %397 = arith.mulf %396, %394 : vector<8x32xf32>
    %398 = arith.mulf %387, %374 : vector<8x32xf32>
    %399 = arith.addf %397, %398 : vector<8x32xf32>
    %400 = vector.extract_strided_slice %222 {offsets = [56, 0], sizes = [8, 96], strides = [1, 1]} : vector<64x96xf32> to vector<8x96xf32>
    %401 = arith.addf %400, %209 : vector<8x96xf32>
    %cst_69 = arith.constant dense<0.000000e+00> : vector<8x96xf32>
    %402 = tpu.matmul %399, %223, %cst_69 {dimension_numbers = #tpu.dot_dimension_numbers<[1], [0], [0], [1], [0, 0, 1, 1], [], []>} : vector<8x32xf32>, vector<32x96xf32>, vector<8x96xf32> -> vector<8x96xf32>
    %403 = vector.extract_strided_slice %401 {offsets = [0, 0], sizes = [8, 64], strides = [1, 1]} : vector<8x96xf32> to vector<8x64xf32>
    %404 = vector.extract_strided_slice %402 {offsets = [0, 0], sizes = [8, 64], strides = [1, 1]} : vector<8x96xf32> to vector<8x64xf32>
    %405 = arith.addf %403, %404 : vector<8x64xf32>
    %406 = arith.negf %405 : vector<8x64xf32>
    %407 = math.exp %406 : vector<8x64xf32>
    %cst_70 = arith.constant 1.000000e+00 : f32
    %408 = vector.broadcast %cst_70 : f32 to vector<8x64xf32>
    %409 = arith.addf %408, %407 : vector<8x64xf32>
    %410 = arith.divf %408, %409 : vector<8x64xf32>
    %411 = vector.extract_strided_slice %410 {offsets = [0, 0], sizes = [8, 32], strides = [1, 1]} : vector<8x64xf32> to vector<8x32xf32>
    %412 = vector.extract_strided_slice %410 {offsets = [0, 32], sizes = [8, 32], strides = [1, 1]} : vector<8x64xf32> to vector<8x32xf32>
    %413 = vector.extract_strided_slice %401 {offsets = [0, 64], sizes = [8, 32], strides = [1, 1]} : vector<8x96xf32> to vector<8x32xf32>
    %414 = vector.extract_strided_slice %402 {offsets = [0, 64], sizes = [8, 32], strides = [1, 1]} : vector<8x96xf32> to vector<8x32xf32>
    %415 = vector.broadcast %224 : vector<1x32xf32> to vector<8x32xf32>
    %416 = arith.addf %414, %415 : vector<8x32xf32>
    %417 = arith.mulf %411, %416 : vector<8x32xf32>
    %418 = arith.addf %413, %417 : vector<8x32xf32>
    %419 = math.tanh %418 : vector<8x32xf32>
    %cst_71 = arith.constant 1.000000e+00 : f32
    %420 = vector.broadcast %cst_71 : f32 to vector<8x32xf32>
    %421 = arith.subf %420, %412 : vector<8x32xf32>
    %422 = arith.mulf %421, %419 : vector<8x32xf32>
    %423 = arith.mulf %412, %399 : vector<8x32xf32>
    %424 = arith.addf %422, %423 : vector<8x32xf32>
    %c0_72 = arith.constant 0 : index
    %c0_73 = arith.constant 0 : index
    %425 = vector.load %arg15[%c0_72, %c0_73] : memref<8x32xf32, #tpu.memory_space<vmem>>, vector<8x32xf32>
    tpu.vector_store %arg15[%c0_72, %c0_73], %424 {strides = array<i32>} : memref<8x32xf32, #tpu.memory_space<vmem>>, vector<8x32xf32>,
    %426 = tpu.concatenate %249, %274, %299, %324, %349, %374, %399, %424 in 0 : vector<8x32xf32>, vector<8x32xf32>, vector<8x32xf32>, vector<8x32xf32>, vector<8x32xf32>, vector<8x32xf32>, vector<8x32xf32>, vector<8x32xf32> -> vector<64x32xf32>
    %c0_74 = arith.constant 0 : index
    %c0_75 = arith.constant 0 : index
    %427 = vector.load %arg12[%c0_74, %c0_75] : memref<32x128xf32, #tpu.memory_space<vmem>>, vector<32x128xf32>
    %cst_76 = arith.constant dense<0.000000e+00> : vector<64x128xf32>
    %428 = tpu.matmul %426, %427, %cst_76 {dimension_numbers = #tpu.dot_dimension_numbers<[1], [0], [0], [1], [0, 0, 1, 1], [], []>} : vector<64x32xf32>, vector<32x128xf32>, vector<64x128xf32> -> vector<64x128xf32>
    %c0_77 = arith.constant 0 : index
    %c0_78 = arith.constant 0 : index
    %429 = vector.load %arg13[%c0_77, %c0_78] : memref<1x128xf32, #tpu.memory_space<vmem>>, vector<1x128xf32>
    %430 = vector.broadcast %429 : vector<1x128xf32> to vector<64x128xf32>
    %431 = arith.addf %428, %430 : vector<64x128xf32>
    %c0_79 = arith.constant 0 : index
    %c0_80 = arith.constant 0 : index
    %432 = vector.load %arg14[%c0_79, %c0_80] : memref<64x128xf32, #tpu.memory_space<vmem>>, vector<64x128xf32>
    tpu.vector_store %arg14[%c0_79, %c0_80], %431 {strides = array<i32>} : memref<64x128xf32, #tpu.memory_space<vmem>>, vector<64x128xf32>,
    return
  }
  func.func @transform_0(%arg0: i32) -> (i32, i32) {
    %c0_i32 = arith.constant 0 : i32
    %c0_i32_0 = arith.constant 0 : i32
    %c0_i32_1 = arith.constant 0 : i32
    return %c0_i32, %c0_i32_0 : i32, i32
  }
  func.func @transform_1(%arg0: i32) -> (i32, i32) {
    %c0_i32 = arith.constant 0 : i32
    %c0_i32_0 = arith.constant 0 : i32
    %c0_i32_1 = arith.constant 0 : i32
    return %c0_i32, %c0_i32_0 : i32, i32
  }
  func.func @transform_2(%arg0: i32) -> (i32, i32) {
    %c0_i32 = arith.constant 0 : i32
    %c0_i32_0 = arith.constant 0 : i32
    %c0_i32_1 = arith.constant 0 : i32
    return %c0_i32, %c0_i32_0 : i32, i32
  }
  func.func @transform_3(%arg0: i32) -> (i32, i32) {
    %c0_i32 = arith.constant 0 : i32
    %c0_i32_0 = arith.constant 0 : i32
    %c0_i32_1 = arith.constant 0 : i32
    return %c0_i32, %c0_i32_0 : i32, i32
  }
  func.func @transform_4(%arg0: i32) -> (i32, i32) {
    %c0_i32 = arith.constant 0 : i32
    %c0_i32_0 = arith.constant 0 : i32
    %c0_i32_1 = arith.constant 0 : i32
    return %c0_i32, %c0_i32_0 : i32, i32
  }
  func.func @transform_5(%arg0: i32) -> (i32, i32) {
    %c0_i32 = arith.constant 0 : i32
    %c0_i32_0 = arith.constant 0 : i32
    %c0_i32_1 = arith.constant 0 : i32
    return %c0_i32, %c0_i32_0 : i32, i32
  }
  func.func @transform_6(%arg0: i32) -> (i32, i32) {
    %c0_i32 = arith.constant 0 : i32
    %c0_i32_0 = arith.constant 0 : i32
    %c0_i32_1 = arith.constant 0 : i32
    return %c0_i32, %c0_i32_0 : i32, i32
  }
  func.func @transform_7(%arg0: i32) -> (i32, i32) {
    %c0_i32 = arith.constant 0 : i32
    %c0_i32_0 = arith.constant 0 : i32
    %c0_i32_1 = arith.constant 0 : i32
    return %c0_i32, %c0_i32_0 : i32, i32
  }
  func.func @transform_8(%arg0: i32) -> (i32, i32) {
    %c0_i32 = arith.constant 0 : i32
    %c0_i32_0 = arith.constant 0 : i32
    %c0_i32_1 = arith.constant 0 : i32
    return %c0_i32, %c0_i32_0 : i32, i32
  }
  func.func @transform_9(%arg0: i32) -> (i32, i32) {
    %c0_i32 = arith.constant 0 : i32
    %c0_i32_0 = arith.constant 0 : i32
    %c0_i32_1 = arith.constant 0 : i32
    return %c0_i32, %c0_i32_0 : i32, i32
  }
  func.func @transform_10(%arg0: i32) -> (i32, i32) {
    %c0_i32 = arith.constant 0 : i32
    %c0_i32_0 = arith.constant 0 : i32
    %c0_i32_1 = arith.constant 0 : i32
    return %c0_i32, %c0_i32_0 : i32, i32
  }
  func.func @transform_11(%arg0: i32) -> (i32, i32) {
    %c0_i32 = arith.constant 0 : i32
    %c0_i32_0 = arith.constant 0 : i32
    %c0_i32_1 = arith.constant 0 : i32
    return %c0_i32, %c0_i32_0 : i32, i32
  }
  func.func @transform_12(%arg0: i32) -> (i32, i32) {
    %c0_i32 = arith.constant 0 : i32
    %c0_i32_0 = arith.constant 0 : i32
    %c0_i32_1 = arith.constant 0 : i32
    return %c0_i32, %c0_i32_0 : i32, i32
  }
  func.func @transform_13(%arg0: i32) -> (i32, i32) {
    %c0_i32 = arith.constant 0 : i32
    %c0_i32_0 = arith.constant 0 : i32
    %c0_i32_1 = arith.constant 0 : i32
    return %c0_i32, %c0_i32_0 : i32, i32
  }
  func.func @transform_14(%arg0: i32) -> (i32, i32) {
    %c0_i32 = arith.constant 0 : i32
    %c0_i32_0 = arith.constant 0 : i32
    %c0_i32_1 = arith.constant 0 : i32
    return %c0_i32, %c0_i32_0 : i32, i32
  }
}

</mosaic_0001>

<bundles_post_ra>
// kernel: encoder_decoder_forward.1
= control target key start
LH: loop header
LB: loop body
LE: loop exit
PB: predicated region body
PF: predicated region fallthrough
CT: control target
= control target key end

     0   :  { %v47_v0 = vlaneseq  ;;  %v1679_v13 = vmov 0.0   ;;  %v1681_v29 = vmov 1.0   ;;  %vm195_vm6 = vcmask 261120   ;;  %s2278_s5 = inlined_call_operand.vmem [shape: f32[1,32], index: 5, kind: input, shape index: {}]   ;;  %s2279_s3 = inlined_call_operand.vmem [shape: f32[32,96], index: 3, kind: input, shape index: {}]   ;;  %s2280_s2 = inlined_call_operand.vmem [shape: f32[128,96], index: 2, kind: input, shape index: {}]   ;;  %s2281_s0 = inlined_call_operand.vmem [shape: s32[8,8], index: 0, kind: input, shape index: {}]   ;;  %s2282_s4 = inlined_call_operand.vmem [shape: f32[1,96], index: 4, kind: input, shape index: {}]   ;;  %s2283_s6 = inlined_call_operand.vmem [shape: f32[128,96], index: 6, kind: input, shape index: {}]   ;;  %s2284_s1 = inlined_call_operand.vmem [shape: s32[8,8], index: 1, kind: input, shape index: {}]   ;;  %s2285_s9 = inlined_call_operand.vmem [shape: f32[1,96], index: 9, kind: input, shape index: {}]   ;;  %s2286_s8 = inlined_call_operand.vmem [shape: f32[32,96], index: 8, kind: input, shape index: {}]   ;;  %s2287_s7 = inlined_call_operand.vmem [shape: f32[32,96], index: 7, kind: input, shape index: {}]   ;;  %s2288_s10 = inlined_call_operand.vmem [shape: f32[1,32], index: 10, kind: input, shape index: {}]   ;;  %s2289_s11 = inlined_call_operand.vmem [shape: f32[32,128], index: 11, kind: input, shape index: {}]   ;;  %s2290_s12 = inlined_call_operand.vmem [shape: f32[1,128], index: 12, kind: input, shape index: {}]   ;;  %s2291_s13 = inlined_call_operand.vmem [shape: f32[64,128], index: 13, kind: output, shape index: {0}]   ;;  %s2292_s14 = inlined_call_operand.vmem [shape: f32[8,32], index: 14, kind: output, shape index: {1}]  }
   0x1   :  { %v1762_v2 = vld [vmem:[%s2279_s3 + $0x18] sm:$0xff]  ;;  %v1767_v3 = vld [vmem:[%s2279_s3 + $0x10] sm:$0xff]  ;;  %v1777_v5 = vld [vmem:[%s2279_s3 + $0x8] sm:$0xff] }
   0x2   :  { %v51_v1 = vshrl.u32 %v47_v0, 7  ;;  %211 = vmatpush.msra.mxu3 %v1762_v2  ;;  %v144_v4 = vld [vmem:[%s2280_s2 + $0x78] sm:$0xff]  ;;  %281 = vmatpush.msra.mxu2 %v1762_v2  ;;  %v143_v6 = vld [vmem:[%s2280_s2 + $0x70] sm:$0xff]  ;;  %v1785_v7 = vld [vmem:[%s2281_s0] sm:$0xff]  ;;  %v1867_v27 = vand.u32 127, %v47_v0 }
   0x3   :  { %149 = vmatpush.msra.mxu0 %v144_v4  ;;  %v142_v8 = vld [vmem:[%s2280_s2 + $0x68] sm:$0xff]  ;;  %v1795_v9 = vld [vmem:[%s2279_s3] sm:$0xff]  ;;  %v49_v11 = vperm.slane %v1785_v7, 0  ;;  %v140_v12 = vld [vmem:[%s2280_s2 + $0x58] sm:$0xff]  ;;  %606 = vmatpush.msra.mxu1 %v1762_v2  ;;  %v56_v22 = vperm.slane %v1785_v7, 1 }
   0x4   :  { %1575 = vset.pattern.permute.xlu0 %v51_v1  ;;  %212 = vmatpush.msra.mxu3 %v1767_v3  ;;  %v141_v10 = vld [vmem:[%s2280_s2 + $0x60] sm:$0xff]  ;;  %v139_v14 = vld [vmem:[%s2280_s2 + $0x50] sm:$0xff]  ;;  %v138_v15 = vld [vmem:[%s2280_s2 + $0x48] sm:$0xff] }
   0x5   :  { %282 = vmatpush.msra.mxu2 %v1767_v3  ;;  %150 = vmatpush.msra.mxu0 %v143_v6  ;;  %v137_v16 = vld [vmem:[%s2280_s2 + $0x40] sm:$0xff]  ;;  %v136_v18 = vld [vmem:[%s2280_s2 + $0x38] sm:$0xff]  ;;  %v135_v19 = vld [vmem:[%s2280_s2 + $0x30] sm:$0xff] }
   0x6   :  { %1576 = vset.pattern.permute.xlu2 %v51_v1  ;;  %213 = vmatpush.msra.mxu3 %v1777_v5  ;;  %v1578_v17 = vld [vmem:[%s2278_s5] ss:$0 sm:$0xff]  ;;  %s1680_s5 = smov 64   ;;  %v134_v20 = vld [vmem:[%s2280_s2 + $0x28] sm:$0xff]  ;;  %v132_v23 = vld [vmem:[%s2280_s2 + $0x18] sm:$0xff] }
   0x7   :  { %283 = vmatpush.msra.mxu2 %v1777_v5  ;;  %151 = vmatpush.msra.mxu0 %v142_v8  ;;  %v133_v21 = vld [vmem:[%s2280_s2 + $0x20] sm:$0xff]  ;;  %v131_v24 = vld [vmem:[%s2280_s2 + $0x10] sm:$0xff]  ;;  %v130_v25 = vld [vmem:[%s2280_s2 + $0x8] sm:$0xff] }
   0x8   :  { %1577 = vset.pattern.permute.xlu1 %v51_v1  ;;  %214 = vmatpush.msra.mxu3 %v1795_v9  ;;  %v129_v26 = vld [vmem:[%s2280_s2] sm:$0xff] }
   0x9   :  { %284 = vmatpush.msra.mxu2 %v1795_v9  ;;  %215 = vmatmul.f32.vlgmr.msra.gmra.mxu3 %v1679_v13  ;;  %v1880_v34 = vld [vmem:[%s2282_s4] ss:$0 sm:$0xff]  ;;  %s1682_s4 = smov 96  }
   0xa   :  { %152 = vmatpush.msra.mxu0 %v141_v10  ;;  %346 = vmatpush.msrb.mxu3 %v1762_v2 }
   0xb   :  { %476 = vmatpush.msrb.mxu2 %v1762_v2  ;;  %607 = vmatpush.msra.mxu1 %v1767_v3 }
   0xc   :  { %54 = vperm.xlu0 %1575, %v49_v11   ;;  %153 = vmatpush.msra.mxu0 %v140_v12 }
   0xd   :  { %347 = vmatpush.msrb.mxu3 %v1767_v3  ;;  %477 = vmatpush.msrb.mxu2 %v1767_v3 }
   0xe   :  { %154 = vmatpush.msra.mxu0 %v139_v14  ;;  %608 = vmatpush.msra.mxu1 %v1777_v5 }
   0xf   :  { %348 = vmatpush.msrb.mxu3 %v1777_v5  ;;  %478 = vmatpush.msrb.mxu2 %v1777_v5 }
  0x10   :  { %155 = vmatpush.msra.mxu0 %v138_v15  ;;  %609 = vmatpush.msra.mxu1 %v1795_v9 }
  0x11   :  { %349 = vmatpush.msrb.mxu3 %v1795_v9  ;;  %479 = vmatpush.msrb.mxu2 %v1795_v9 }
  0x12   :  { %156 = vmatpush.msra.mxu0 %v137_v16 }
  0x13   :  { %541 = vmatpush.msra.mxu3 %v1762_v2 }
  0x14   :  { %241 = vrot.lane.b32.xlu0 %v1578_v17, %s1680_s5  ;;  %157 = vmatpush.msra.mxu0 %v136_v18 }
  0x15   :  { %542 = vmatpush.msra.mxu3 %v1767_v3 }
  0x16   :  { %158 = vmatpush.msra.mxu0 %v135_v19 }
  0x17   :  { %543 = vmatpush.msra.mxu3 %v1777_v5 }
  0x18   :  { %159 = vmatpush.msra.mxu0 %v134_v20 }
  0x19   :  { %544 = vmatpush.msra.mxu3 %v1795_v9 }
  0x1a   :  { %160 = vmatpush.msra.mxu0 %v133_v21 }
  0x1c   :  { %61 = vperm.xlu0 %1575, %v56_v22   ;;  %161 = vmatpush.msra.mxu0 %v132_v23  ;;  %v63_v22 = vperm.slane %v1785_v7, 2 }
  0x1e   :  { %162 = vmatpush.msra.mxu0 %v131_v24 }
  0x20   :  { %163 = vmatpush.msra.mxu0 %v130_v25 }
  0x22   :  { %164 = vmatpush.msra.mxu0 %v129_v26 }
  0x24   :  { %411 = vmatpush.msrb.mxu0 %v1762_v2 }
  0x26   :  { %412 = vmatpush.msrb.mxu0 %v1767_v3 }
  0x28   :  { %413 = vmatpush.msrb.mxu0 %v1777_v5 }
  0x2a   :  { %414 = vmatpush.msrb.mxu0 %v1795_v9 }
  0x7e   :  { %v55_v28 = vpop.permute.xlu0 %54 }
  0x7f   :  { %vm105_vm0 = vcmp.eq.s32.totalorder %v55_v28, %v1867_v27 }
  0x80   :  { %1503 = vmatmul.msk.f32.vlgmr.msra.gmra.mxu0 %vm105_vm0, %v1681_v29 }
  0x86   :  { %v1871_v30 = vpop.permute.xlu0 %241 }
  0x8c   :  { %v216_v31 = vpop.f32.mrf.mxu3 }
  0x8d   :  { %v244_v33 = vadd.f32 %v1871_v30, %v216_v31 }
  0x8e   :  { %v62_v32 = vpop.permute.xlu0 %61 }
  0x8f   :  { %vm106_vm1 = vcmp.eq.s32.totalorder %v62_v32, %v1867_v27  ;;  %246 = vrot.lane.b32.xlu1 %v244_v33, %s1680_s5 }
  0x90   :  { %1504 = vmatmul.msk.f32.gmra.mxu0 %vm106_vm1, %v1681_v29 }
  0xfd   :  { %v166_v35 = vpop.f32.mrf.mxu0 }
  0xfe   :  { %v167_v36 = vadd.f32 %v1880_v34, %v166_v35 }
 0x100   :  { %v219_v37 = vadd.f32 %v216_v31, %v167_v36 }
 0x101   :  { %v247_v49 = vpop.permute.xlu1 %246 }
 0x102   :  { %v1511_v38 = vmul.f32 -1.442695, %v219_v37  ;;  %v91_v37 = vperm.slane %v1785_v7, 6 }
 0x104   :  { %1583 = vpow2.f32 %v1511_v38 }
 0x10a   :  { %v1584_v39 = vpop.eup %1583 }
 0x10b   :  { %v223_v40 = vadd.f32 1.0, %v1584_v39 }
 0x10d   :  { %1585 = vrcp.f32 %v223_v40  ;;  %v235_v44 = vand.u32 2147483648, %v223_v40  ;;  %v233_v46 = vand.u32 2147483647, %v223_v40  ;;  %vm229_vm3 = vweird.f32 %v223_v40  ;;  %v169_v0 = vpop.f32.mrf.mxu0 }
 0x10e   :  { %v170_v1 = vadd.f32 %v1880_v34, %v169_v0 }
 0x10f   :  { %v236_v48 = vor.u32 1.1754944e-38, %v235_v44  ;;  %vm234_vm5 = vcmp.eq.f32.partialorder %v233_v46, 8.507059e+37 }
 0x113   :  { %v1586_v41 = vpop.eup %1585 }
 0x114   :  { %v225_v42 = vmul.f32 %v1586_v41, %v223_v40  ;;  %vm230_vm2 = vweird.f32 %v1586_v41 }
 0x115   :  { %vm231_vm4 = vmor %vm229_vm3, %vm230_vm2 }
 0x116   :  { %v226_v43 = vsub.f32 1.0, %v225_v42 }
 0x118   :  { %v227_v45 = vmul.f32 %v1586_v41, %v226_v43 }
 0x11a   :  { %v228_v47 = vadd.f32 %v1586_v41, %v227_v45 }
 0x11c   :  { %v232_v50 = vsel %vm231_vm4, %v1586_v41, %v228_v47 }
 0x11d   :  { %v237_v51 = vsel %vm234_vm5, %v236_v48, %v232_v50 }
 0x11e   :  { %v249_v52 = vmul.f32 %v247_v49, %v237_v51  ;;  %v256_v56 = vsub.f32 1.0, %v237_v51  ;;  %v262_v58 = vmul.f32 0.0, %v237_v51 }
 0x120   :  { %251 = vrot.lane.b32.xlu1 %v249_v52, %s1680_s5 }
 0x192   :  { %v252_v53 = vpop.permute.xlu1 %251 }
 0x193   :  { %v254_v54 = vadd.f32 %v252_v53, %v167_v36  ;;  %v70_v36 = vperm.slane %v1785_v7, 3 }
 0x195   :  { %1587 = vtanh.f32 %v254_v54 }
 0x19b   :  { %v1588_v55 = vpop.eup %1587 }
 0x19c   :  { %258 = vrot.lane.b32.xlu2 %v1588_v55, %s1682_s4 }
 0x1f6   :  { %v259_v57 = vpop.permute.xlu2 %258 }
 0x1f7   :  { %v261_v59 = vmul.f32 %v259_v57, %v256_v56  ;;  %v77_v56 = vperm.slane %v1785_v7, 4 }
 0x1f9   :  { %v263_v60 = vadd.f32 %v262_v58, %v261_v59  ;;  %v98_v58 = vperm.slane %v1785_v7, 7 }
 0x1fb   :  { %265 = vrot.lane.b32.xlu2 %v263_v60, %s1682_s4 }
 0x255   :  { %v266_v61 = vpop.permute.xlu2 %265 }
 0x256   :  { %1512 = vmatmul.msk.f32.vlgmr.msra.gmra.mxu2 %vm195_vm6, %v266_v61 }
 0x257   :  { %671 = vmatpush.msra.mxu2 %v1762_v2 }
 0x259   :  { %672 = vmatpush.msra.mxu2 %v1767_v3 }
 0x25b   :  { %673 = vmatpush.msra.mxu2 %v1777_v5 }
 0x25d   :  { %674 = vmatpush.msra.mxu2 %v1795_v9 }
 0x2d9   :  { %v286_v62 = vpop.f32.mrf.mxu2 }
 0x2da   :  { %v309_v63 = vadd.f32 %v286_v62, %v1871_v30  ;;  %v289_v4 = vadd.f32 %v286_v62, %v170_v1  ;;  %v84_v62 = vperm.slane %v1785_v7, 5 }
 0x2dc   :  { %311 = vrot.lane.b32.xlu1 %v309_v63, %s1680_s5  ;;  %v1513_v6 = vmul.f32 -1.442695, %v289_v4 }
 0x2de   :  { %1589 = vpow2.f32 %v1513_v6 }
 0x2e4   :  { %v1590_v8 = vpop.eup %1589 }
 0x2e5   :  { %v293_v10 = vadd.f32 1.0, %v1590_v8 }
 0x2e7   :  { %1591 = vrcp.f32 %v293_v10  ;;  %v305_v9 = vand.u32 2147483648, %v293_v10  ;;  %vm299_vm8 = vweird.f32 %v293_v10  ;;  %v303_v13 = vand.u32 2147483647, %v293_v10 }
 0x2e9   :  { %v306_v15 = vor.u32 1.1754944e-38, %v305_v9  ;;  %vm304_vm10 = vcmp.eq.f32.partialorder %v303_v13, 8.507059e+37 }
 0x2ed   :  { %v1592_v2 = vpop.eup %1591 }
 0x2ee   :  { %v295_v3 = vmul.f32 %v1592_v2, %v293_v10  ;;  %vm300_vm7 = vweird.f32 %v1592_v2 }
 0x2ef   :  { %vm301_vm9 = vmor %vm299_vm8, %vm300_vm7 }
 0x2f0   :  { %v296_v11 = vsub.f32 1.0, %v295_v3 }
 0x2f2   :  { %v297_v5 = vmul.f32 %v1592_v2, %v296_v11 }
 0x2f4   :  { %v298_v12 = vadd.f32 %v1592_v2, %v297_v5 }
 0x2f6   :  { %v302_v14 = vsel %vm301_vm9, %v1592_v2, %v298_v12 }
 0x2f7   :  { %v307_v17 = vsel %vm304_vm10, %v306_v15, %v302_v14 }
 0x2f8   :  { %v321_v23 = vsub.f32 1.0, %v307_v17  ;;  %v327_v25 = vmul.f32 %v307_v17, %v263_v60 }
 0x34e   :  { %v312_v16 = vpop.permute.xlu1 %311 }
 0x34f   :  { %v314_v18 = vmul.f32 %v312_v16, %v307_v17 }
 0x351   :  { %316 = vrot.lane.b32.xlu2 %v314_v18, %s1680_s5 }
 0x359   :  { %68 = vperm.xlu2 %1576, %v63_v22  }
 0x3ab   :  { %v317_v19 = vpop.permute.xlu2 %316 }
 0x3ac   :  { %v319_v20 = vadd.f32 %v317_v19, %v170_v1 }
 0x3ae   :  { %1593 = vtanh.f32 %v319_v20 }
 0x3b3   :  { %v69_v31 = vpop.permute.xlu2 %68 }
 0x3b4   :  { %v1594_v21 = vpop.eup %1593  ;;  %vm107_vm11 = vcmp.eq.s32.totalorder %v69_v31, %v1867_v27 }
 0x3b5   :  { %323 = vrot.lane.b32.xlu0 %v1594_v21, %s1682_s4  ;;  %1505 = vmatmul.msk.f32.gmra.mxu0 %vm107_vm11, %v1681_v29 }
 0x427   :  { %v324_v24 = vpop.permute.xlu0 %323 }
 0x428   :  { %v326_v26 = vmul.f32 %v324_v24, %v321_v23 }
 0x42a   :  { %v328_v28 = vadd.f32 %v327_v25, %v326_v26 }
 0x42c   :  { %330 = vrot.lane.b32.xlu1 %v328_v28, %s1682_s4 }
 0x432   :  { %v172_v38 = vpop.f32.mrf.mxu0 }
 0x433   :  { %v173_v39 = vadd.f32 %v1880_v34, %v172_v38 }
 0x49e   :  { %v331_v32 = vpop.permute.xlu1 %330 }
 0x49f   :  { %1514 = vmatmul.msk.f32.vlgmr.msrb.gmra.mxu3 %vm195_vm6, %v331_v32 }
 0x522   :  { %v351_v33 = vpop.f32.mrf.mxu3 }
 0x523   :  { %v374_v35 = vadd.f32 %v351_v33, %v1871_v30  ;;  %v354_v40 = vadd.f32 %v351_v33, %v173_v39 }
 0x525   :  { %376 = vrot.lane.b32.xlu0 %v374_v35, %s1680_s5  ;;  %v1515_v41 = vmul.f32 -1.442695, %v354_v40 }
 0x527   :  { %1595 = vpow2.f32 %v1515_v41 }
 0x52d   :  { %75 = vperm.xlu0 %1575, %v70_v36   ;;  %v1596_v42 = vpop.eup %1595 }
 0x52e   :  { %v358_v43 = vadd.f32 1.0, %v1596_v42 }
 0x530   :  { %1597 = vrcp.f32 %v358_v43  ;;  %v370_v49 = vand.u32 2147483648, %v358_v43  ;;  %vm364_vm13 = vweird.f32 %v358_v43  ;;  %v368_v50 = vand.u32 2147483647, %v358_v43 }
 0x532   :  { %v371_v52 = vor.u32 1.1754944e-38, %v370_v49  ;;  %vm369_vm15 = vcmp.eq.f32.partialorder %v368_v50, 8.507059e+37 }
 0x535   :  { %96 = vperm.xlu0 %1575, %v91_v37  }
 0x536   :  { %v1598_v44 = vpop.eup %1597 }
 0x537   :  { %v360_v45 = vmul.f32 %v1598_v44, %v358_v43  ;;  %vm365_vm12 = vweird.f32 %v1598_v44 }
 0x538   :  { %vm366_vm14 = vmor %vm364_vm13, %vm365_vm12 }
 0x539   :  { %v361_v46 = vsub.f32 1.0, %v360_v45 }
 0x53b   :  { %v362_v47 = vmul.f32 %v1598_v44, %v361_v46 }
 0x53d   :  { %v363_v48 = vadd.f32 %v1598_v44, %v362_v47 }
 0x53f   :  { %v367_v51 = vsel %vm366_vm14, %v1598_v44, %v363_v48 }
 0x540   :  { %v372_v54 = vsel %vm369_vm15, %v371_v52, %v367_v51 }
 0x541   :  { %v386_v0 = vsub.f32 1.0, %v372_v54  ;;  %v392_v4 = vmul.f32 %v372_v54, %v328_v28 }
 0x597   :  { %v377_v53 = vpop.permute.xlu0 %376 }
 0x598   :  { %v379_v55 = vmul.f32 %v377_v53, %v372_v54 }
 0x59a   :  { %381 = vrot.lane.b32.xlu1 %v379_v55, %s1680_s5 }
 0x59f   :  { %v76_v57 = vpop.permute.xlu0 %75 }
 0x5a0   :  { %vm108_vm0 = vcmp.eq.s32.totalorder %v76_v57, %v1867_v27 }
 0x5a1   :  { %1506 = vmatmul.msk.f32.gmra.mxu0 %vm108_vm0, %v1681_v29 }
 0x5a2   :  { %82 = vperm.xlu1 %1577, %v77_v56  }
 0x5a7   :  { %v97_v2 = vpop.permute.xlu0 %96 }
 0x5a8   :  { %vm111_vm3 = vcmp.eq.s32.totalorder %v97_v2, %v1867_v27 }
 0x5aa   :  { %103 = vperm.xlu1 %1577, %v98_v58  }
 0x60c   :  { %v382_v59 = vpop.permute.xlu1 %381 }
 0x60d   :  { %v384_v60 = vadd.f32 %v382_v59, %v173_v39 }
 0x60f   :  { %1599 = vtanh.f32 %v384_v60 }
 0x614   :  { %v83_v63 = vpop.permute.xlu1 %82 }
 0x615   :  { %v1600_v61 = vpop.eup %1599  ;;  %vm109_vm1 = vcmp.eq.s32.totalorder %v83_v63, %v1867_v27 }
 0x616   :  { %388 = vrot.lane.b32.xlu2 %v1600_v61, %s1682_s4  ;;  %1507 = vmatmul.msk.f32.gmra.mxu0 %vm109_vm1, %v1681_v29 }
 0x61c   :  { %v104_v7 = vpop.permute.xlu1 %103 }
 0x61d   :  { %vm112_vm4 = vcmp.eq.s32.totalorder %v104_v7, %v1867_v27 }
 0x61e   :  { %89 = vperm.xlu2 %1576, %v84_v62   ;;  %v175_v11 = vpop.f32.mrf.mxu0 }
 0x61f   :  { %v176_v16 = vadd.f32 %v1880_v34, %v175_v11 }
 0x670   :  { %v389_v1 = vpop.permute.xlu2 %388 }
 0x671   :  { %v391_v6 = vmul.f32 %v389_v1, %v386_v0 }
 0x673   :  { %v393_v8 = vadd.f32 %v392_v4, %v391_v6 }
 0x675   :  { %395 = vrot.lane.b32.xlu2 %v393_v8, %s1682_s4 }
 0x678   :  { %v90_v10 = vpop.permute.xlu2 %89 }
 0x679   :  { %vm110_vm2 = vcmp.eq.s32.totalorder %v90_v10, %v1867_v27 }
 0x67a   :  { %1508 = vmatmul.msk.f32.gmra.mxu0 %vm110_vm2, %v1681_v29 }
 0x682   :  { %1509 = vmatmul.msk.f32.gmra.mxu0 %vm111_vm3, %v1681_v29 }
 0x68a   :  { %1510 = vmatmul.msk.f32.gmra.mxu0 %vm112_vm4, %v1681_v29 }
 0x693   :  { %v178_v5 = vpop.f32.mrf.mxu0 }
 0x694   :  { %v179_v48 = vadd.f32 %v1880_v34, %v178_v5 }
 0x6cf   :  { %v396_v3 = vpop.permute.xlu2 %395 }
 0x6d0   :  { %1516 = vmatmul.msk.f32.vlgmr.msrb.gmra.mxu0 %vm195_vm6, %v396_v3 }
 0x6f7   :  { %v1923_v12 = vpop.f32.mrf.mxu0 }
 0x6ff   :  { %v1925_v9 = vpop.f32.mrf.mxu0 }
 0x707   :  { %v1927_v13 = vpop.f32.mrf.mxu0 }
 0x74d   :  { %v416_v14 = vpop.f32.mrf.mxu0 }
 0x74e   :  { %v439_v15 = vadd.f32 %v416_v14, %v1871_v30  ;;  %v419_v17 = vadd.f32 %v416_v14, %v176_v16 }
 0x750   :  { %441 = vrot.lane.b32.xlu0 %v439_v15, %s1680_s5  ;;  %v1517_v18 = vmul.f32 -1.442695, %v419_v17  ;;  %v182_v15 = vadd.f32 %v1880_v34, %v1923_v12 }
 0x752   :  { %1601 = vpow2.f32 %v1517_v18 }
 0x758   :  { %v1602_v19 = vpop.eup %1601 }
 0x759   :  { %v423_v20 = vadd.f32 1.0, %v1602_v19 }
 0x75b   :  { %1603 = vrcp.f32 %v423_v20  ;;  %v435_v26 = vand.u32 2147483648, %v423_v20  ;;  %vm429_vm7 = vweird.f32 %v423_v20  ;;  %v433_v28 = vand.u32 2147483647, %v423_v20 }
 0x75d   :  { %v436_v32 = vor.u32 1.1754944e-38, %v435_v26  ;;  %vm434_vm9 = vcmp.eq.f32.partialorder %v433_v28, 8.507059e+37 }
 0x761   :  { %v1604_v21 = vpop.eup %1603 }
 0x762   :  { %v425_v22 = vmul.f32 %v1604_v21, %v423_v20  ;;  %vm430_vm5 = vweird.f32 %v1604_v21 }
 0x763   :  { %vm431_vm8 = vmor %vm429_vm7, %vm430_vm5 }
 0x764   :  { %v426_v23 = vsub.f32 1.0, %v425_v22 }
 0x766   :  { %v427_v24 = vmul.f32 %v1604_v21, %v426_v23 }
 0x768   :  { %v428_v25 = vadd.f32 %v1604_v21, %v427_v24 }
 0x76a   :  { %v432_v31 = vsel %vm431_vm8, %v1604_v21, %v428_v25 }
 0x76b   :  { %v437_v35 = vsel %vm434_vm9, %v436_v32, %v432_v31 }
 0x76c   :  { %v451_v40 = vsub.f32 1.0, %v437_v35  ;;  %v457_v42 = vmul.f32 %v437_v35, %v393_v8 }
 0x7c2   :  { %v442_v33 = vpop.permute.xlu0 %441 }
 0x7c3   :  { %v444_v36 = vmul.f32 %v442_v33, %v437_v35 }
 0x7c5   :  { %446 = vrot.lane.b32.xlu1 %v444_v36, %s1680_s5 }
 0x837   :  { %v447_v37 = vpop.permute.xlu1 %446 }
 0x838   :  { %v449_v38 = vadd.f32 %v447_v37, %v176_v16 }
 0x83a   :  { %1605 = vtanh.f32 %v449_v38 }
 0x840   :  { %v1606_v39 = vpop.eup %1605 }
 0x841   :  { %453 = vrot.lane.b32.xlu2 %v1606_v39, %s1682_s4 }
 0x89b   :  { %v454_v41 = vpop.permute.xlu2 %453 }
 0x89c   :  { %v456_v43 = vmul.f32 %v454_v41, %v451_v40 }
 0x89e   :  { %v458_v44 = vadd.f32 %v457_v42, %v456_v43 }
 0x8a0   :  { %460 = vrot.lane.b32.xlu0 %v458_v44, %s1682_s4 }
 0x912   :  { %v461_v45 = vpop.permute.xlu0 %460 }
 0x913   :  { %1518 = vmatmul.msk.f32.vlgmr.msrb.gmra.mxu2 %vm195_vm6, %v461_v45 }
 0x996   :  { %v481_v46 = vpop.f32.mrf.mxu2 }
 0x997   :  { %v504_v47 = vadd.f32 %v481_v46, %v1871_v30  ;;  %v484_v49 = vadd.f32 %v481_v46, %v179_v48  ;;  %v185_v46 = vadd.f32 %v1880_v34, %v1925_v9 }
 0x999   :  { %506 = vrot.lane.b32.xlu1 %v504_v47, %s1680_s5  ;;  %v1519_v50 = vmul.f32 -1.442695, %v484_v49 }
 0x99b   :  { %1607 = vpow2.f32 %v1519_v50 }
 0x9a1   :  { %v1608_v51 = vpop.eup %1607 }
 0x9a2   :  { %v488_v52 = vadd.f32 1.0, %v1608_v51 }
 0x9a4   :  { %1609 = vrcp.f32 %v488_v52  ;;  %v500_v58 = vand.u32 2147483648, %v488_v52  ;;  %vm494_vm11 = vweird.f32 %v488_v52  ;;  %v498_v59 = vand.u32 2147483647, %v488_v52 }
 0x9a6   :  { %v501_v61 = vor.u32 1.1754944e-38, %v500_v58  ;;  %vm499_vm13 = vcmp.eq.f32.partialorder %v498_v59, 8.507059e+37 }
 0x9aa   :  { %v1610_v53 = vpop.eup %1609 }
 0x9ab   :  { %v490_v54 = vmul.f32 %v1610_v53, %v488_v52  ;;  %vm495_vm10 = vweird.f32 %v1610_v53 }
 0x9ac   :  { %vm496_vm12 = vmor %vm494_vm11, %vm495_vm10 }
 0x9ad   :  { %v491_v55 = vsub.f32 1.0, %v490_v54 }
 0x9af   :  { %v492_v56 = vmul.f32 %v1610_v53, %v491_v55 }
 0x9b1   :  { %v493_v57 = vadd.f32 %v1610_v53, %v492_v56 }
 0x9b3   :  { %v497_v60 = vsel %vm496_vm12, %v1610_v53, %v493_v57 }
 0x9b4   :  { %v502_v63 = vsel %vm499_vm13, %v501_v61, %v497_v60 }
 0x9b5   :  { %v516_v8 = vsub.f32 1.0, %v502_v63  ;;  %v522_v2 = vmul.f32 %v502_v63, %v458_v44 }
 0xa0b   :  { %v507_v62 = vpop.permute.xlu1 %506 }
 0xa0c   :  { %v509_v0 = vmul.f32 %v507_v62, %v502_v63 }
 0xa0e   :  { %511 = vrot.lane.b32.xlu2 %v509_v0, %s1680_s5 }
 0xa68   :  { %v512_v1 = vpop.permute.xlu2 %511 }
 0xa69   :  { %v514_v4 = vadd.f32 %v512_v1, %v179_v48 }
 0xa6b   :  { %1611 = vtanh.f32 %v514_v4 }
 0xa71   :  { %v1612_v6 = vpop.eup %1611 }
 0xa72   :  { %518 = vrot.lane.b32.xlu0 %v1612_v6, %s1682_s4 }
 0xae4   :  { %v519_v10 = vpop.permute.xlu0 %518 }
 0xae5   :  { %v521_v7 = vmul.f32 %v519_v10, %v516_v8 }
 0xae7   :  { %v523_v3 = vadd.f32 %v522_v2, %v521_v7 }
 0xae9   :  { %525 = vrot.lane.b32.xlu1 %v523_v3, %s1682_s4 }
 0xb5b   :  { %v526_v11 = vpop.permute.xlu1 %525 }
 0xb5c   :  { %1520 = vmatmul.msk.f32.vlgmr.msra.gmra.mxu3 %vm195_vm6, %v526_v11  ;;  %v188_v11 = vadd.f32 %v1880_v34, %v1927_v13  ;;  %v842_v34 = vld [vmem:[%s2283_s6 + $0x68] sm:$0xff]  ;;  %v841_v13 = vld [vmem:[%s2283_s6 + $0x60] sm:$0xff] }
 0xbdf   :  { %v546_v5 = vpop.f32.mrf.mxu3 }
 0xbe0   :  { %v569_v14 = vadd.f32 %v546_v5, %v1871_v30  ;;  %v549_v16 = vadd.f32 %v546_v5, %v182_v15 }
 0xbe2   :  { %571 = vrot.lane.b32.xlu2 %v569_v14, %s1680_s5  ;;  %v1521_v17 = vmul.f32 -1.442695, %v549_v16 }
 0xbe4   :  { %1613 = vpow2.f32 %v1521_v17 }
 0xbea   :  { %v1614_v18 = vpop.eup %1613 }
 0xbeb   :  { %v553_v19 = vadd.f32 1.0, %v1614_v18  ;;  %v844_v18 = vld [vmem:[%s2283_s6 + $0x78] sm:$0xff] }
 0xbec   :  { %849 = vmatpush.msrb.mxu1 %v844_v18 }
 0xbed   :  { %1615 = vrcp.f32 %v553_v19  ;;  %v565_v25 = vand.u32 2147483648, %v553_v19  ;;  %vm559_vm15 = vweird.f32 %v553_v19  ;;  %v563_v26 = vand.u32 2147483647, %v553_v19 }
 0xbef   :  { %v566_v31 = vor.u32 1.1754944e-38, %v565_v25  ;;  %vm564_vm1 = vcmp.eq.f32.partialorder %v563_v26, 8.507059e+37  ;;  %v837_v25 = vld [vmem:[%s2283_s6 + $0x40] sm:$0xff] }
 0xbf3   :  { %v1616_v20 = vpop.eup %1615 }
 0xbf4   :  { %v555_v21 = vmul.f32 %v1616_v20, %v553_v19  ;;  %vm560_vm14 = vweird.f32 %v1616_v20 }
 0xbf5   :  { %vm561_vm0 = vmor %vm559_vm15, %vm560_vm14 }
 0xbf6   :  { %v556_v22 = vsub.f32 1.0, %v555_v21  ;;  %v840_v21 = vld [vmem:[%s2283_s6 + $0x58] sm:$0xff] }
 0xbf8   :  { %v557_v23 = vmul.f32 %v1616_v20, %v556_v22  ;;  %v839_v22 = vld [vmem:[%s2283_s6 + $0x50] sm:$0xff] }
 0xbfa   :  { %v558_v24 = vadd.f32 %v1616_v20, %v557_v23 }
 0xbfc   :  { %v562_v28 = vsel %vm561_vm0, %v1616_v20, %v558_v24  ;;  %v838_v24 = vld [vmem:[%s2283_s6 + $0x48] sm:$0xff] }
 0xbfd   :  { %v567_v32 = vsel %vm564_vm1, %v566_v31, %v562_v28  ;;  %v836_v28 = vld [vmem:[%s2283_s6 + $0x38] sm:$0xff] }
 0xbfe   :  { %v581_v38 = vsub.f32 1.0, %v567_v32  ;;  %v587_v40 = vmul.f32 %v567_v32, %v523_v3 }
 0xc3c   :  { %v572_v12 = vpop.permute.xlu2 %571 }
 0xc3d   :  { %v574_v33 = vmul.f32 %v572_v12, %v567_v32  ;;  %v835_v32 = vld [vmem:[%s2283_s6 + $0x30] sm:$0xff] }
 0xc3f   :  { %576 = vrot.lane.b32.xlu0 %v574_v33, %s1680_s5 }
 0xcb1   :  { %v577_v35 = vpop.permute.xlu0 %576 }
 0xcb2   :  { %v579_v36 = vadd.f32 %v577_v35, %v182_v15  ;;  %v834_v35 = vld [vmem:[%s2283_s6 + $0x28] sm:$0xff] }
 0xcb4   :  { %1617 = vtanh.f32 %v579_v36 }
 0xcba   :  { %v1618_v37 = vpop.eup %1617 }
 0xcbb   :  { %583 = vrot.lane.b32.xlu1 %v1618_v37, %s1682_s4 }
 0xd2d   :  { %v584_v39 = vpop.permute.xlu1 %583 }
 0xd2e   :  { %v586_v41 = vmul.f32 %v584_v39, %v581_v38 }
 0xd30   :  { %v588_v42 = vadd.f32 %v587_v40, %v586_v41  ;;  %v2003_v40 = vld [vmem:[%s2284_s1] sm:$0xff] }
 0xd31   :  { %v749_v41 = vperm.slane %v2003_v40, 0 }
 0xd32   :  { %590 = vrot.lane.b32.xlu2 %v588_v42, %s1682_s4 }
 0xd8c   :  { %v591_v43 = vpop.permute.xlu2 %590 }
 0xd8d   :  { %1522 = vmatmul.msk.f32.vlgmr.msra.gmra.mxu1 %vm195_vm6, %v591_v43  ;;  %v832_v43 = vld [vmem:[%s2283_s6 + $0x18] sm:$0xff] }
 0xe0a   :  { %v611_v44 = vpop.f32.mrf.mxu1 }
 0xe0b   :  { %v634_v45 = vadd.f32 %v611_v44, %v1871_v30  ;;  %v614_v47 = vadd.f32 %v611_v44, %v185_v46  ;;  %v831_v44 = vld [vmem:[%s2283_s6 + $0x10] sm:$0xff] }
 0xe0d   :  { %636 = vrot.lane.b32.xlu0 %v634_v45, %s1680_s5  ;;  %v1523_v48 = vmul.f32 -1.442695, %v614_v47  ;;  %v830_v45 = vld [vmem:[%s2283_s6 + $0x8] sm:$0xff] }
 0xe0f   :  { %1619 = vpow2.f32 %v1523_v48 }
 0xe15   :  { %v1620_v49 = vpop.eup %1619 }
 0xe16   :  { %v618_v50 = vadd.f32 1.0, %v1620_v49 }
 0xe18   :  { %1621 = vrcp.f32 %v618_v50  ;;  %v630_v56 = vand.u32 2147483648, %v618_v50  ;;  %vm624_vm3 = vweird.f32 %v618_v50  ;;  %v628_v57 = vand.u32 2147483647, %v618_v50 }
 0xe1a   :  { %v631_v59 = vor.u32 1.1754944e-38, %v630_v56  ;;  %vm629_vm5 = vcmp.eq.f32.partialorder %v628_v57, 8.507059e+37  ;;  %v720_v56 = vld [vmem:[%s2287_s7 + $0x8] sm:$0xff]  ;;  %v2053_v57 = vld [vmem:[%s2286_s8] sm:$0xff] }
 0xe1e   :  { %v1622_v51 = vpop.eup %1621 }
 0xe1f   :  { %v620_v52 = vmul.f32 %v1622_v51, %v618_v50  ;;  %vm625_vm2 = vweird.f32 %v1622_v51 }
 0xe20   :  { %vm626_vm4 = vmor %vm624_vm3, %vm625_vm2 }
 0xe21   :  { %v621_v53 = vsub.f32 1.0, %v620_v52  ;;  %v722_v52 = vld [vmem:[%s2287_s7 + $0x18] sm:$0xff] }
 0xe22   :  { %740 = vmatpush.msrb.mxu3 %v722_v52 }
 0xe23   :  { %v622_v54 = vmul.f32 %v1622_v51, %v621_v53  ;;  %v2035_v53 = vld [vmem:[%s2286_s8 + $0x10] sm:$0xff] }
 0xe25   :  { %v623_v55 = vadd.f32 %v1622_v51, %v622_v54  ;;  %v721_v54 = vld [vmem:[%s2287_s7 + $0x10] sm:$0xff] }
 0xe26   :  { %741 = vmatpush.msrb.mxu3 %v721_v54 }
 0xe27   :  { %v627_v58 = vsel %vm626_vm4, %v1622_v51, %v623_v55  ;;  %v2027_v51 = vld [vmem:[%s2286_s8 + $0x18] sm:$0xff]  ;;  %v2044_v55 = vld [vmem:[%s2286_s8 + $0x8] sm:$0xff] }
 0xe28   :  { %v632_v60 = vsel %vm629_vm5, %v631_v59, %v627_v58  ;;  %908 = vmatpush.msrb.mxu2 %v2027_v51  ;;  %v719_v58 = vld [vmem:[%s2287_s7] sm:$0xff]  ;;  %742 = vmatpush.msrb.mxu3 %v720_v56 }
 0xe29   :  { %v646_v1 = vsub.f32 1.0, %v632_v60  ;;  %v652_v6 = vmul.f32 %v632_v60, %v588_v42  ;;  %v833_v42 = vld [vmem:[%s2283_s6 + $0x20] sm:$0xff] }
 0xe2a   :  { %909 = vmatpush.msrb.mxu2 %v2035_v53  ;;  %743 = vmatpush.msrb.mxu3 %v719_v58 }
 0xe2c   :  { %910 = vmatpush.msrb.mxu2 %v2044_v55  ;;  %979 = vmatpush.msra.mxu3 %v2027_v51 }
 0xe2e   :  { %911 = vmatpush.msrb.mxu2 %v2053_v57  ;;  %980 = vmatpush.msra.mxu3 %v2035_v53 }
 0xe30   :  { %981 = vmatpush.msra.mxu3 %v2044_v55 }
 0xe32   :  { %982 = vmatpush.msra.mxu3 %v2053_v57 }
 0xe7f   :  { %v637_v9 = vpop.permute.xlu0 %636 }
 0xe80   :  { %v639_v61 = vmul.f32 %v637_v9, %v632_v60 }
 0xe82   :  { %641 = vrot.lane.b32.xlu1 %v639_v61, %s1680_s5 }
 0xef4   :  { %v642_v62 = vpop.permute.xlu1 %641 }
 0xef5   :  { %v644_v63 = vadd.f32 %v642_v62, %v185_v46  ;;  %v829_v46 = vld [vmem:[%s2283_s6] sm:$0xff] }
 0xef7   :  { %1623 = vtanh.f32 %v644_v63  ;;  %v1581_v63 = vld [vmem:[%s2288_s10] ss:$0 sm:$0xff] }
 0xefd   :  { %v1624_v0 = vpop.eup %1623 }
 0xefe   :  { %648 = vrot.lane.b32.xlu2 %v1624_v0, %s1682_s4 }
 0xf58   :  { %v649_v4 = vpop.permute.xlu2 %648 }
 0xf59   :  { %v651_v8 = vmul.f32 %v649_v4, %v646_v1 }
 0xf5b   :  { %v1957_v10 = vadd.f32 %v652_v6, %v651_v8  ;;  %v2091_v8 = vld [vmem:[%s2285_s9] ss:$0 sm:$0xff] }
 0xf5d   :  { %655 = vrot.lane.b32.xlu0 %v1957_v10, %s1682_s4 }
 0xfcf   :  { %v656_v2 = vpop.permute.xlu0 %655 }
 0xfd0   :  { %1524 = vmatmul.msk.f32.vlgmr.msra.gmra.mxu2 %vm195_vm6, %v656_v2 }
 0xfd1   :  { %1045 = vmatpush.msra.mxu2 %v2027_v51 }
 0xfd3   :  { %1046 = vmatpush.msra.mxu2 %v2035_v53 }
 0xfd5   :  { %1047 = vmatpush.msra.mxu2 %v2044_v55 }
 0xfd7   :  { %1048 = vmatpush.msra.mxu2 %v2053_v57 }
0x1053   :  { %v676_v7 = vpop.f32.mrf.mxu2 }
0x1054   :  { %v699_v3 = vadd.f32 %v676_v7, %v1871_v30  ;;  %v679_v5 = vadd.f32 %v676_v7, %v188_v11  ;;  %v843_v30 = vld [vmem:[%s2283_s6 + $0x70] sm:$0xff] }
0x1055   :  { %850 = vmatpush.msrb.mxu1 %v843_v30 }
0x1056   :  { %701 = vrot.lane.b32.xlu1 %v699_v3, %s1680_s5  ;;  %v1525_v14 = vmul.f32 -1.442695, %v679_v5 }
0x1057   :  { %851 = vmatpush.msrb.mxu1 %v842_v34 }
0x1058   :  { %1625 = vpow2.f32 %v1525_v14 }
0x1059   :  { %852 = vmatpush.msrb.mxu1 %v841_v13 }
0x105b   :  { %853 = vmatpush.msrb.mxu1 %v840_v21 }
0x105d   :  { %854 = vmatpush.msrb.mxu1 %v839_v22 }
0x105e   :  { %v1626_v15 = vpop.eup %1625 }
0x105f   :  { %v683_v16 = vadd.f32 1.0, %v1626_v15  ;;  %855 = vmatpush.msrb.mxu1 %v838_v24 }
0x1061   :  { %1627 = vrcp.f32 %v683_v16  ;;  %v695_v31 = vand.u32 2147483648, %v683_v16  ;;  %856 = vmatpush.msrb.mxu1 %v837_v25  ;;  %vm689_vm8 = vweird.f32 %v683_v16  ;;  %v693_v12 = vand.u32 2147483647, %v683_v16 }
0x1062   :  { %v756_v25 = vperm.slane %v2003_v40, 1 }
0x1063   :  { %857 = vmatpush.msrb.mxu1 %v836_v28  ;;  %v696_v36 = vor.u32 1.1754944e-38, %v695_v31  ;;  %vm694_vm10 = vcmp.eq.f32.partialorder %v693_v12, 8.507059e+37 }
0x1065   :  { %858 = vmatpush.msrb.mxu1 %v835_v32 }
0x1067   :  { %v1628_v17 = vpop.eup %1627  ;;  %859 = vmatpush.msrb.mxu1 %v834_v35 }
0x1068   :  { %v685_v19 = vmul.f32 %v1628_v17, %v683_v16  ;;  %vm690_vm7 = vweird.f32 %v1628_v17 }
0x1069   :  { %vm691_vm9 = vmor %vm689_vm8, %vm690_vm7  ;;  %860 = vmatpush.msrb.mxu1 %v833_v42 }
0x106a   :  { %v686_v20 = vsub.f32 1.0, %v685_v19 }
0x106b   :  { %861 = vmatpush.msrb.mxu1 %v832_v43 }
0x106c   :  { %v687_v23 = vmul.f32 %v1628_v17, %v686_v20 }
0x106d   :  { %862 = vmatpush.msrb.mxu1 %v831_v44 }
0x106e   :  { %v688_v26 = vadd.f32 %v1628_v17, %v687_v23 }
0x106f   :  { %863 = vmatpush.msrb.mxu1 %v830_v45 }
0x1070   :  { %v692_v33 = vsel %vm691_vm9, %v1628_v17, %v688_v26 }
0x1071   :  { %v697_v38 = vsel %vm694_vm10, %v696_v36, %v692_v33  ;;  %864 = vmatpush.msrb.mxu1 %v829_v46 }
0x1072   :  { %v711_v59 = vsub.f32 1.0, %v697_v38  ;;  %v717_v60 = vmul.f32 %v697_v38, %v1957_v10 }
0x10c8   :  { %v702_v37 = vpop.permute.xlu1 %701 }
0x10c9   :  { %v704_v39 = vmul.f32 %v702_v37, %v697_v38 }
0x10cb   :  { %706 = vrot.lane.b32.xlu2 %v704_v39, %s1680_s5 }
0x10d3   :  { %754 = vperm.xlu2 %1576, %v749_v41  }
0x1125   :  { %v707_v47 = vpop.permute.xlu2 %706 }
0x1126   :  { %v709_v48 = vadd.f32 %v707_v47, %v188_v11 }
0x1128   :  { %1629 = vtanh.f32 %v709_v48 }
0x112d   :  { %v755_v49 = vpop.permute.xlu2 %754 }
0x112e   :  { %v1630_v50 = vpop.eup %1629  ;;  %vm805_vm11 = vcmp.eq.s32.totalorder %v755_v49, %v1867_v27 }
0x112f   :  { %713 = vrot.lane.b32.xlu0 %v1630_v50, %s1682_s4  ;;  %1535 = vmatmul.msk.f32.vlgmr.msrb.gmra.mxu1 %vm805_vm11, %v1681_v29 }
0x1137   :  { %938 = vrot.lane.b32.xlu0 %v1581_v63, %s1680_s5 }
0x11a1   :  { %v714_v9 = vpop.permute.xlu0 %713 }
0x11a2   :  { %v716_v61 = vmul.f32 %v714_v9, %v711_v59 }
0x11a4   :  { %v718_v62 = vadd.f32 %v717_v60, %v716_v61 }
0x11a6   :  { %724 = vrot.lane.b32.xlu1 %v718_v62, %s1682_s4 }
0x11a9   :  { %v2084_v1 = vpop.permute.xlu0 %938 }
0x11ac   :  { %v866_v10 = vpop.f32.mrf.mxu1 }
0x11ad   :  { %v867_v7 = vadd.f32 %v2091_v8, %v866_v10 }
0x1218   :  { %v725_v0 = vpop.permute.xlu1 %724 }
0x1219   :  { %1526 = vmatmul.msk.f32.vlgmr.msrb.gmra.mxu3 %vm195_vm6, %v725_v0  ;;  %1543 = vmatmul.msk.f32.vlgmr.msrb.gmra.mxu2 %vm195_vm6, %v725_v0  ;;  %v763_v0 = vperm.slane %v2003_v40, 2 }
0x121a   :  { %1111 = vmatpush.msrb.mxu3 %v2027_v51  ;;  %1177 = vmatpush.msrb.mxu2 %v2027_v51 }
0x121c   :  { %1112 = vmatpush.msrb.mxu3 %v2035_v53  ;;  %1178 = vmatpush.msrb.mxu2 %v2035_v53 }
0x121e   :  { %1113 = vmatpush.msrb.mxu3 %v2044_v55  ;;  %1179 = vmatpush.msrb.mxu2 %v2044_v55 }
0x1220   :  { %1114 = vmatpush.msrb.mxu3 %v2053_v57  ;;  %1180 = vmatpush.msrb.mxu2 %v2053_v57 }
0x129c   :  { %v913_v4 = vpop.f32.mrf.mxu2  ;;  %v2093_v2 = vpop.f32.mrf.mxu3 }
0x129d   :  { %v941_v6 = vadd.f32 %v2084_v1, %v913_v4  ;;  %v895_v3 = vadd.f32 %v867_v7, %v2093_v2 }
0x129f   :  { %943 = vrot.lane.b32.xlu1 %v941_v6, %s1680_s5  ;;  %v916_v11 = vadd.f32 %v913_v4, %v895_v3 }
0x12a1   :  { %v1544_v5 = vmul.f32 -1.442695, %v916_v11 }
0x12a3   :  { %1631 = vpow2.f32 %v1544_v5 }
0x12a9   :  { %v1632_v14 = vpop.eup %1631 }
0x12aa   :  { %v920_v15 = vadd.f32 1.0, %v1632_v14 }
0x12ac   :  { %1633 = vrcp.f32 %v920_v15  ;;  %v932_v34 = vand.u32 2147483648, %v920_v15  ;;  %vm926_vm13 = vweird.f32 %v920_v15  ;;  %v930_v13 = vand.u32 2147483647, %v920_v15 }
0x12ae   :  { %v933_v21 = vor.u32 1.1754944e-38, %v932_v34  ;;  %vm931_vm15 = vcmp.eq.f32.partialorder %v930_v13, 8.507059e+37 }
0x12b2   :  { %v1634_v16 = vpop.eup %1633 }
0x12b3   :  { %v922_v17 = vmul.f32 %v1634_v16, %v920_v15  ;;  %vm927_vm12 = vweird.f32 %v1634_v16 }
0x12b4   :  { %vm928_vm14 = vmor %vm926_vm13, %vm927_vm12 }
0x12b5   :  { %v923_v18 = vsub.f32 1.0, %v922_v17 }
0x12b7   :  { %v924_v30 = vmul.f32 %v1634_v16, %v923_v18 }
0x12b9   :  { %v925_v19 = vadd.f32 %v1634_v16, %v924_v30 }
0x12bb   :  { %v929_v20 = vsel %vm928_vm14, %v1634_v16, %v925_v19 }
0x12bc   :  { %v934_v23 = vsel %vm931_vm15, %v933_v21, %v929_v20 }
0x12bd   :  { %v953_v32 = vsub.f32 1.0, %v934_v23  ;;  %v959_v35 = vmul.f32 %v934_v23, %v718_v62 }
0x1311   :  { %v944_v22 = vpop.permute.xlu1 %943 }
0x1312   :  { %v946_v24 = vmul.f32 %v944_v22, %v934_v23 }
0x1314   :  { %948 = vrot.lane.b32.xlu2 %v946_v24, %s1680_s5 }
0x131c   :  { %761 = vperm.xlu2 %1576, %v756_v25  }
0x136e   :  { %v949_v26 = vpop.permute.xlu2 %948 }
0x136f   :  { %v951_v28 = vadd.f32 %v949_v26, %v895_v3 }
0x1371   :  { %1635 = vtanh.f32 %v951_v28 }
0x1376   :  { %v762_v31 = vpop.permute.xlu2 %761 }
0x1377   :  { %v1636_v12 = vpop.eup %1635  ;;  %vm806_vm0 = vcmp.eq.s32.totalorder %v762_v31, %v1867_v27 }
0x1378   :  { %955 = vrot.lane.b32.xlu0 %v1636_v12, %s1682_s4  ;;  %1536 = vmatmul.msk.f32.gmra.mxu1 %vm806_vm0, %v1681_v29 }
0x13ea   :  { %v956_v33 = vpop.permute.xlu0 %955 }
0x13eb   :  { %v958_v36 = vmul.f32 %v956_v33, %v953_v32 }
0x13ed   :  { %v960_v37 = vadd.f32 %v959_v35, %v958_v36 }
0x13ef   :  { %963 = vrot.lane.b32.xlu1 %v960_v37, %s1682_s4 }
0x13f5   :  { %v869_v42 = vpop.f32.mrf.mxu1 }
0x13f6   :  { %v870_v43 = vadd.f32 %v2091_v8, %v869_v42 }
0x13f8   :  { %v961_v44 = vadd.f32 %v870_v43, %v2093_v2 }
0x1461   :  { %v2103_v38 = vpop.permute.xlu1 %963 }
0x1462   :  { %1545 = vmatmul.msk.f32.vlgmr.msra.gmra.mxu3 %vm195_vm6, %v2103_v38 }
0x1463   :  { %1243 = vmatpush.msra.mxu3 %v2027_v51 }
0x1465   :  { %1244 = vmatpush.msra.mxu3 %v2035_v53 }
0x1467   :  { %1245 = vmatpush.msra.mxu3 %v2044_v55 }
0x1469   :  { %1246 = vmatpush.msra.mxu3 %v2053_v57 }
0x14e5   :  { %v984_v39 = vpop.f32.mrf.mxu3 }
0x14e6   :  { %v1007_v41 = vadd.f32 %v984_v39, %v2084_v1  ;;  %v987_v45 = vadd.f32 %v984_v39, %v961_v44  ;;  %v770_v39 = vperm.slane %v2003_v40, 3 }
0x14e8   :  { %1009 = vrot.lane.b32.xlu0 %v1007_v41, %s1680_s5  ;;  %v1546_v46 = vmul.f32 -1.442695, %v987_v45 }
0x14ea   :  { %1637 = vpow2.f32 %v1546_v46 }
0x14f0   :  { %v1638_v47 = vpop.eup %1637 }
0x14f1   :  { %v991_v48 = vadd.f32 1.0, %v1638_v47 }
0x14f3   :  { %1639 = vrcp.f32 %v991_v48  ;;  %v1003_v58 = vand.u32 2147483648, %v991_v48  ;;  %vm997_vm2 = vweird.f32 %v991_v48  ;;  %v1001_v59 = vand.u32 2147483647, %v991_v48 }
0x14f5   :  { %v1004_v60 = vor.u32 1.1754944e-38, %v1003_v58  ;;  %vm1002_vm4 = vcmp.eq.f32.partialorder %v1001_v59, 8.507059e+37 }
0x14f9   :  { %v1640_v49 = vpop.eup %1639 }
0x14fa   :  { %v993_v50 = vmul.f32 %v1640_v49, %v991_v48  ;;  %vm998_vm1 = vweird.f32 %v1640_v49 }
0x14fb   :  { %vm999_vm3 = vmor %vm997_vm2, %vm998_vm1 }
0x14fc   :  { %v994_v52 = vsub.f32 1.0, %v993_v50 }
0x14fe   :  { %v995_v54 = vmul.f32 %v1640_v49, %v994_v52 }
0x1500   :  { %v996_v56 = vadd.f32 %v1640_v49, %v995_v54 }
0x1502   :  { %v1000_v9 = vsel %vm999_vm3, %v1640_v49, %v996_v56 }
0x1503   :  { %v1005_v62 = vsel %vm1002_vm4, %v1004_v60, %v1000_v9 }
0x1504   :  { %v1019_v3 = vsub.f32 1.0, %v1005_v62  ;;  %v1025_v5 = vmul.f32 %v1005_v62, %v960_v37 }
0x155a   :  { %v1010_v61 = vpop.permute.xlu0 %1009 }
0x155b   :  { %v1012_v63 = vmul.f32 %v1010_v61, %v1005_v62 }
0x155d   :  { %1014 = vrot.lane.b32.xlu1 %v1012_v63, %s1680_s5 }
0x1565   :  { %768 = vperm.xlu1 %1577, %v763_v0  }
0x15cf   :  { %v1015_v4 = vpop.permute.xlu1 %1014 }
0x15d0   :  { %v1017_v6 = vadd.f32 %v1015_v4, %v961_v44 }
0x15d2   :  { %1641 = vtanh.f32 %v1017_v6 }
0x15d7   :  { %v769_v10 = vpop.permute.xlu1 %768 }
0x15d8   :  { %v1642_v7 = vpop.eup %1641  ;;  %vm807_vm5 = vcmp.eq.s32.totalorder %v769_v10, %v1867_v27 }
0x15d9   :  { %1021 = vrot.lane.b32.xlu2 %v1642_v7, %s1682_s4  ;;  %1537 = vmatmul.msk.f32.gmra.mxu1 %vm807_vm5, %v1681_v29 }
0x1633   :  { %v1022_v11 = vpop.permute.xlu2 %1021 }
0x1634   :  { %v1024_v14 = vmul.f32 %v1022_v11, %v1019_v3 }
0x1636   :  { %v1026_v15 = vadd.f32 %v1025_v5, %v1024_v14  ;;  %v777_v5 = vperm.slane %v2003_v40, 4 }
0x1638   :  { %1029 = vrot.lane.b32.xlu0 %v1026_v15, %s1682_s4 }
0x1656   :  { %v872_v30 = vpop.f32.mrf.mxu1 }
0x1657   :  { %v873_v19 = vadd.f32 %v2091_v8, %v872_v30 }
0x1659   :  { %v1027_v34 = vadd.f32 %v873_v19, %v2093_v2 }
0x16aa   :  { %v2121_v16 = vpop.permute.xlu0 %1029 }
0x16ab   :  { %1547 = vmatmul.msk.f32.vlgmr.msra.gmra.mxu2 %vm195_vm6, %v2121_v16 }
0x16ac   :  { %1309 = vmatpush.msra.mxu2 %v2027_v51 }
0x16ae   :  { %1310 = vmatpush.msra.mxu2 %v2035_v53 }
0x16b0   :  { %1311 = vmatpush.msra.mxu2 %v2044_v55 }
0x16b2   :  { %1312 = vmatpush.msra.mxu2 %v2053_v57 }
0x172e   :  { %v1050_v17 = vpop.f32.mrf.mxu2 }
0x172f   :  { %v1073_v18 = vadd.f32 %v1050_v17, %v2084_v1  ;;  %v1053_v13 = vadd.f32 %v1050_v17, %v1027_v34 }
0x1731   :  { %1075 = vrot.lane.b32.xlu2 %v1073_v18, %s1680_s5  ;;  %v1548_v20 = vmul.f32 -1.442695, %v1053_v13 }
0x1733   :  { %1643 = vpow2.f32 %v1548_v20 }
0x1739   :  { %v1644_v21 = vpop.eup %1643 }
0x173a   :  { %v1057_v22 = vadd.f32 1.0, %v1644_v21 }
0x173c   :  { %1645 = vrcp.f32 %v1057_v22  ;;  %v1069_v31 = vand.u32 2147483648, %v1057_v22  ;;  %vm1063_vm8 = vweird.f32 %v1057_v22  ;;  %v1067_v12 = vand.u32 2147483647, %v1057_v22 }
0x173e   :  { %v1070_v33 = vor.u32 1.1754944e-38, %v1069_v31  ;;  %vm1068_vm10 = vcmp.eq.f32.partialorder %v1067_v12, 8.507059e+37 }
0x1742   :  { %v1646_v23 = vpop.eup %1645 }
0x1743   :  { %v1059_v24 = vmul.f32 %v1646_v23, %v1057_v22  ;;  %vm1064_vm7 = vweird.f32 %v1646_v23 }
0x1744   :  { %vm1065_vm9 = vmor %vm1063_vm8, %vm1064_vm7 }
0x1745   :  { %v1060_v25 = vsub.f32 1.0, %v1059_v24 }
0x1747   :  { %v1061_v26 = vmul.f32 %v1646_v23, %v1060_v25 }
0x1749   :  { %v1062_v28 = vadd.f32 %v1646_v23, %v1061_v26 }
0x174b   :  { %v1066_v32 = vsel %vm1065_vm9, %v1646_v23, %v1062_v28 }
0x174c   :  { %v1071_v36 = vsel %vm1068_vm10, %v1070_v33, %v1066_v32 }
0x174d   :  { %v1085_v45 = vsub.f32 1.0, %v1071_v36  ;;  %v1091_v47 = vmul.f32 %v1071_v36, %v1026_v15 }
0x178b   :  { %v1076_v35 = vpop.permute.xlu2 %1075 }
0x178c   :  { %v1078_v37 = vmul.f32 %v1076_v35, %v1071_v36 }
0x178e   :  { %1080 = vrot.lane.b32.xlu0 %v1078_v37, %s1680_s5 }
0x1796   :  { %775 = vperm.xlu0 %1575, %v770_v39  }
0x1800   :  { %v1081_v41 = vpop.permute.xlu0 %1080 }
0x1801   :  { %v1083_v42 = vadd.f32 %v1081_v41, %v1027_v34 }
0x1803   :  { %1647 = vtanh.f32 %v1083_v42 }
0x1808   :  { %v776_v43 = vpop.permute.xlu0 %775 }
0x1809   :  { %v1648_v44 = vpop.eup %1647  ;;  %vm808_vm11 = vcmp.eq.s32.totalorder %v776_v43, %v1867_v27 }
0x180a   :  { %1087 = vrot.lane.b32.xlu1 %v1648_v44, %s1682_s4  ;;  %1538 = vmatmul.msk.f32.gmra.mxu1 %vm808_vm11, %v1681_v29 }
0x187c   :  { %v1088_v46 = vpop.permute.xlu1 %1087 }
0x187d   :  { %v1090_v48 = vmul.f32 %v1088_v46, %v1085_v45 }
0x187f   :  { %v1092_v49 = vadd.f32 %v1091_v47, %v1090_v48  ;;  %v784_v48 = vperm.slane %v2003_v40, 5 }
0x1881   :  { %1095 = vrot.lane.b32.xlu2 %v1092_v49, %s1682_s4 }
0x1887   :  { %v875_v56 = vpop.f32.mrf.mxu1 }
0x1888   :  { %v876_v58 = vadd.f32 %v2091_v8, %v875_v56 }
0x188a   :  { %v1093_v59 = vadd.f32 %v876_v58, %v2093_v2 }
0x18db   :  { %v2139_v50 = vpop.permute.xlu2 %1095 }
0x18dc   :  { %1549 = vmatmul.msk.f32.vlgmr.msrb.gmra.mxu3 %vm195_vm6, %v2139_v50 }
0x18dd   :  { %1375 = vmatpush.msrb.mxu3 %v2027_v51 }
0x18df   :  { %1376 = vmatpush.msrb.mxu3 %v2035_v53 }
0x18e1   :  { %1377 = vmatpush.msrb.mxu3 %v2044_v55 }
0x18e3   :  { %1378 = vmatpush.msrb.mxu3 %v2053_v57 }
0x195f   :  { %v1116_v52 = vpop.f32.mrf.mxu3 }
0x1960   :  { %v1139_v54 = vadd.f32 %v1116_v52, %v2084_v1  ;;  %v1119_v9 = vadd.f32 %v1116_v52, %v1093_v59 }
0x1962   :  { %1141 = vrot.lane.b32.xlu1 %v1139_v54, %s1680_s5  ;;  %v1550_v60 = vmul.f32 -1.442695, %v1119_v9 }
0x1964   :  { %1649 = vpow2.f32 %v1550_v60 }
0x196a   :  { %v1650_v51 = vpop.eup %1649 }
0x196b   :  { %v1123_v61 = vadd.f32 1.0, %v1650_v51 }
0x196d   :  { %1651 = vrcp.f32 %v1123_v61  ;;  %v1135_v0 = vand.u32 2147483648, %v1123_v61  ;;  %vm1129_vm13 = vweird.f32 %v1123_v61  ;;  %v1133_v4 = vand.u32 2147483647, %v1123_v61 }
0x196f   :  { %v1136_v10 = vor.u32 1.1754944e-38, %v1135_v0  ;;  %vm1134_vm15 = vcmp.eq.f32.partialorder %v1133_v4, 8.507059e+37 }
0x1973   :  { %v1652_v53 = vpop.eup %1651 }
0x1974   :  { %v1125_v55 = vmul.f32 %v1652_v53, %v1123_v61  ;;  %vm1130_vm12 = vweird.f32 %v1652_v53 }
0x1975   :  { %vm1131_vm14 = vmor %vm1129_vm13, %vm1130_vm12 }
0x1976   :  { %v1126_v62 = vsub.f32 1.0, %v1125_v55 }
0x1978   :  { %v1127_v57 = vmul.f32 %v1652_v53, %v1126_v62 }
0x197a   :  { %v1128_v63 = vadd.f32 %v1652_v53, %v1127_v57 }
0x197c   :  { %v1132_v6 = vsel %vm1131_vm14, %v1652_v53, %v1128_v63 }
0x197d   :  { %v1137_v3 = vsel %vm1134_vm15, %v1136_v10, %v1132_v6 }
0x197e   :  { %v1151_v30 = vsub.f32 1.0, %v1137_v3  ;;  %v1157_v34 = vmul.f32 %v1137_v3, %v1092_v49 }
0x19d4   :  { %v1142_v7 = vpop.permute.xlu1 %1141 }
0x19d5   :  { %v1144_v11 = vmul.f32 %v1142_v7, %v1137_v3 }
0x19d7   :  { %1146 = vrot.lane.b32.xlu2 %v1144_v11, %s1680_s5 }
0x19df   :  { %782 = vperm.xlu2 %1576, %v777_v5  }
0x1a31   :  { %v1147_v14 = vpop.permute.xlu2 %1146 }
0x1a32   :  { %v1149_v15 = vadd.f32 %v1147_v14, %v1093_v59 }
0x1a34   :  { %1653 = vtanh.f32 %v1149_v15 }
0x1a39   :  { %v783_v17 = vpop.permute.xlu2 %782 }
0x1a3a   :  { %v1654_v18 = vpop.eup %1653  ;;  %vm809_vm0 = vcmp.eq.s32.totalorder %v783_v17, %v1867_v27 }
0x1a3b   :  { %1153 = vrot.lane.b32.xlu0 %v1654_v18, %s1682_s4  ;;  %1539 = vmatmul.msk.f32.gmra.mxu1 %vm809_vm0, %v1681_v29 }
0x1aad   :  { %v1154_v19 = vpop.permute.xlu0 %1153 }
0x1aae   :  { %v1156_v13 = vmul.f32 %v1154_v19, %v1151_v30 }
0x1ab0   :  { %v1158_v20 = vadd.f32 %v1157_v34, %v1156_v13 }
0x1ab2   :  { %1161 = vrot.lane.b32.xlu1 %v1158_v20, %s1682_s4 }
0x1ab8   :  { %v878_v24 = vpop.f32.mrf.mxu1 }
0x1ab9   :  { %v879_v25 = vadd.f32 %v2091_v8, %v878_v24 }
0x1abb   :  { %v1159_v26 = vadd.f32 %v879_v25, %v2093_v2 }
0x1b24   :  { %v2157_v21 = vpop.permute.xlu1 %1161 }
0x1b25   :  { %1551 = vmatmul.msk.f32.vlgmr.msrb.gmra.mxu2 %vm195_vm6, %v2157_v21 }
0x1ba8   :  { %v1182_v22 = vpop.f32.mrf.mxu2 }
0x1ba9   :  { %v1205_v23 = vadd.f32 %v1182_v22, %v2084_v1  ;;  %v1185_v28 = vadd.f32 %v1182_v22, %v1159_v26 }
0x1bab   :  { %1207 = vrot.lane.b32.xlu0 %v1205_v23, %s1680_s5  ;;  %v1552_v31 = vmul.f32 -1.442695, %v1185_v28 }
0x1bad   :  { %1655 = vpow2.f32 %v1552_v31 }
0x1bb3   :  { %v1656_v12 = vpop.eup %1655 }
0x1bb4   :  { %v1189_v32 = vadd.f32 1.0, %v1656_v12 }
0x1bb6   :  { %1657 = vrcp.f32 %v1189_v32  ;;  %v1201_v41 = vand.u32 2147483648, %v1189_v32  ;;  %vm1195_vm2 = vweird.f32 %v1189_v32  ;;  %v1199_v42 = vand.u32 2147483647, %v1189_v32 }
0x1bb8   :  { %v1202_v44 = vor.u32 1.1754944e-38, %v1201_v41  ;;  %vm1200_vm4 = vcmp.eq.f32.partialorder %v1199_v42, 8.507059e+37 }
0x1bbc   :  { %v1658_v33 = vpop.eup %1657 }
0x1bbd   :  { %v1191_v35 = vmul.f32 %v1658_v33, %v1189_v32  ;;  %vm1196_vm1 = vweird.f32 %v1658_v33 }
0x1bbe   :  { %vm1197_vm3 = vmor %vm1195_vm2, %vm1196_vm1 }
0x1bbf   :  { %v1192_v36 = vsub.f32 1.0, %v1191_v35  ;;  %v1430_v35 = vld [vmem:[%s2289_s11 + $0x10] sm:$0xff] }
0x1bc1   :  { %v1193_v37 = vmul.f32 %v1658_v33, %v1192_v36  ;;  %v1429_v36 = vld [vmem:[%s2289_s11 + $0x8] sm:$0xff] }
0x1bc3   :  { %v1194_v39 = vadd.f32 %v1658_v33, %v1193_v37  ;;  %v1428_v37 = vld [vmem:[%s2289_s11] sm:$0xff] }
0x1bc5   :  { %v1198_v43 = vsel %vm1197_vm3, %v1658_v33, %v1194_v39  ;;  %v1431_v33 = vld [vmem:[%s2289_s11 + $0x18] sm:$0xff] }
0x1bc6   :  { %v1203_v46 = vsel %vm1200_vm4, %v1202_v44, %v1198_v43  ;;  %1450 = vmatpush.msrb.mxu2 %v1431_v33 }
0x1bc7   :  { %v1217_v58 = vsub.f32 1.0, %v1203_v46  ;;  %v1223_v9 = vmul.f32 %v1203_v46, %v1158_v20  ;;  %v791_v20 = vperm.slane %v2003_v40, 6 }
0x1bc8   :  { %1451 = vmatpush.msrb.mxu2 %v1430_v35 }
0x1bca   :  { %1452 = vmatpush.msrb.mxu2 %v1429_v36 }
0x1bcc   :  { %1453 = vmatpush.msrb.mxu2 %v1428_v37 }
0x1c1d   :  { %v1208_v45 = vpop.permute.xlu0 %1207 }
0x1c1e   :  { %v1210_v47 = vmul.f32 %v1208_v45, %v1203_v46 }
0x1c20   :  { %1212 = vrot.lane.b32.xlu1 %v1210_v47, %s1680_s5 }
0x1c28   :  { %789 = vperm.xlu1 %1577, %v784_v48  }
0x1c92   :  { %v1213_v49 = vpop.permute.xlu1 %1212 }
0x1c93   :  { %v1215_v52 = vadd.f32 %v1213_v49, %v1159_v26 }
0x1c95   :  { %1659 = vtanh.f32 %v1215_v52 }
0x1c9a   :  { %v790_v54 = vpop.permute.xlu1 %789 }
0x1c9b   :  { %v1660_v56 = vpop.eup %1659  ;;  %vm810_vm5 = vcmp.eq.s32.totalorder %v790_v54, %v1867_v27 }
0x1c9c   :  { %1219 = vrot.lane.b32.xlu2 %v1660_v56, %s1682_s4  ;;  %1540 = vmatmul.msk.f32.gmra.mxu1 %vm810_vm5, %v1681_v29 }
0x1cf6   :  { %v1220_v59 = vpop.permute.xlu2 %1219 }
0x1cf7   :  { %v1222_v60 = vmul.f32 %v1220_v59, %v1217_v58 }
0x1cf9   :  { %v1224_v51 = vadd.f32 %v1223_v9, %v1222_v60 }
0x1cfb   :  { %1227 = vrot.lane.b32.xlu0 %v1224_v51, %s1682_s4 }
0x1d19   :  { %v881_v62 = vpop.f32.mrf.mxu1 }
0x1d1a   :  { %v882_v57 = vadd.f32 %v2091_v8, %v881_v62 }
0x1d1c   :  { %v1225_v63 = vadd.f32 %v882_v57, %v2093_v2 }
0x1d6d   :  { %v2171_v61 = vpop.permute.xlu0 %1227 }
0x1d6e   :  { %1553 = vmatmul.msk.f32.vlgmr.msra.gmra.mxu3 %vm195_vm6, %v2171_v61 }
0x1d6f   :  { %1567 = vmatpush.msra.mxu3 %v1431_v33 }
0x1d71   :  { %1568 = vmatpush.msra.mxu3 %v1430_v35 }
0x1d73   :  { %1569 = vmatpush.msra.mxu3 %v1429_v36 }
0x1d75   :  { %1570 = vmatpush.msra.mxu3 %v1428_v37 }
0x1df1   :  { %v1248_v53 = vpop.f32.mrf.mxu3 }
0x1df2   :  { %v1271_v55 = vadd.f32 %v1248_v53, %v2084_v1  ;;  %v1251_v0 = vadd.f32 %v1248_v53, %v1225_v63 }
0x1df4   :  { %1273 = vrot.lane.b32.xlu2 %v1271_v55, %s1680_s5  ;;  %v1554_v4 = vmul.f32 -1.442695, %v1251_v0 }
0x1df6   :  { %1661 = vpow2.f32 %v1554_v4 }
0x1dfc   :  { %v1662_v6 = vpop.eup %1661 }
0x1dfd   :  { %v1255_v10 = vadd.f32 1.0, %v1662_v6 }
0x1dff   :  { %1663 = vrcp.f32 %v1255_v10  ;;  %v1267_v15 = vand.u32 2147483648, %v1255_v10  ;;  %vm1261_vm8 = vweird.f32 %v1255_v10  ;;  %v1265_v17 = vand.u32 2147483647, %v1255_v10 }
0x1e01   :  { %v1268_v30 = vor.u32 1.1754944e-38, %v1267_v15  ;;  %vm1266_vm10 = vcmp.eq.f32.partialorder %v1265_v17, 8.507059e+37 }
0x1e05   :  { %v1664_v7 = vpop.eup %1663 }
0x1e06   :  { %v1257_v3 = vmul.f32 %v1664_v7, %v1255_v10  ;;  %vm1262_vm7 = vweird.f32 %v1664_v7 }
0x1e07   :  { %vm1263_vm9 = vmor %vm1261_vm8, %vm1262_vm7 }
0x1e08   :  { %v1258_v11 = vsub.f32 1.0, %v1257_v3  ;;  %v798_v3 = vperm.slane %v2003_v40, 7 }
0x1e0a   :  { %v1259_v5 = vmul.f32 %v1664_v7, %v1258_v11 }
0x1e0c   :  { %v1260_v14 = vadd.f32 %v1664_v7, %v1259_v5 }
0x1e0e   :  { %v1264_v18 = vsel %vm1263_vm9, %v1664_v7, %v1260_v14 }
0x1e0f   :  { %v1269_v34 = vsel %vm1266_vm10, %v1268_v30, %v1264_v18 }
0x1e10   :  { %v1283_v26 = vsub.f32 1.0, %v1269_v34  ;;  %v1289_v31 = vmul.f32 %v1269_v34, %v1224_v51 }
0x1e4e   :  { %v1274_v19 = vpop.permute.xlu2 %1273 }
0x1e4f   :  { %v1276_v13 = vmul.f32 %v1274_v19, %v1269_v34 }
0x1e51   :  { %1278 = vrot.lane.b32.xlu0 %v1276_v13, %s1680_s5 }
0x1e59   :  { %796 = vperm.xlu0 %1575, %v791_v20  }
0x1ec3   :  { %v1279_v22 = vpop.permute.xlu0 %1278 }
0x1ec4   :  { %v1281_v23 = vadd.f32 %v1279_v22, %v1225_v63 }
0x1ec6   :  { %1665 = vtanh.f32 %v1281_v23 }
0x1ecb   :  { %v797_v24 = vpop.permute.xlu0 %796 }
0x1ecc   :  { %v1666_v25 = vpop.eup %1665  ;;  %vm811_vm11 = vcmp.eq.s32.totalorder %v797_v24, %v1867_v27 }
0x1ecd   :  { %1285 = vrot.lane.b32.xlu1 %v1666_v25, %s1682_s4  ;;  %1541 = vmatmul.msk.f32.gmra.mxu1 %vm811_vm11, %v1681_v29 }
0x1f3f   :  { %v1286_v28 = vpop.permute.xlu1 %1285 }
0x1f40   :  { %v1288_v12 = vmul.f32 %v1286_v28, %v1283_v26 }
0x1f42   :  { %v2184_v32 = vadd.f32 %v1289_v31, %v1288_v12 }
0x1f44   :  { %1293 = vrot.lane.b32.xlu2 %v2184_v32, %s1682_s4 }
0x1f4a   :  { %v884_v52 = vpop.f32.mrf.mxu1 }
0x1f4b   :  { %v885_v54 = vadd.f32 %v2091_v8, %v884_v52 }
0x1f4d   :  { %v1291_v56 = vadd.f32 %v885_v54, %v2093_v2 }
0x1f9e   :  { %v2200_v39 = vpop.permute.xlu2 %1293 }
0x1f9f   :  { %1555 = vmatmul.msk.f32.vlgmr.msra.gmra.mxu2 %vm195_vm6, %v2200_v39 }
0x1fa7   :  { %1559 = vmatmul.msk.f32.vlgmr.msrb.gmra.mxu2 %vm195_vm6, %v2103_v38  ;;  %v2219_v38 = vld [vmem:[%s2290_s12] ss:$0 sm:$0xff] }
0x1faf   :  { %1560 = vmatmul.msk.f32.gmra.mxu2 %vm195_vm6, %v2121_v16 }
0x1fb7   :  { %1561 = vmatmul.msk.f32.gmra.mxu2 %vm195_vm6, %v2139_v50 }
0x1fbf   :  { %1562 = vmatmul.msk.f32.gmra.mxu2 %vm195_vm6, %v2157_v21 }
0x1fc7   :  { %1563 = vmatmul.msk.f32.gmra.mxu2 %vm195_vm6, %v2171_v61 }
0x2022   :  { %v1314_v41 = vpop.f32.mrf.mxu2 }
0x2023   :  { %v1337_v42 = vadd.f32 %v1314_v41, %v2084_v1  ;;  %v1317_v58 = vadd.f32 %v1314_v41, %v1291_v56 }
0x2025   :  { %1339 = vrot.lane.b32.xlu1 %v1337_v42, %s1680_s5  ;;  %v1556_v59 = vmul.f32 -1.442695, %v1317_v58 }
0x2027   :  { %1667 = vpow2.f32 %v1556_v59 }
0x202a   :  { %v1455_v16 = vpop.f32.mrf.mxu2 }
0x202b   :  { %v1456_v43 = vadd.f32 %v2219_v38, %v1455_v16 }
0x202d   :  { %1479 = vst [vmem:[%s2291_s13] sm:$0xff] %v1456_v43  ;;  %v1668_v9 = vpop.eup %1667 }
0x202e   :  { %v1321_v60 = vadd.f32 1.0, %v1668_v9 }
0x2030   :  { %1669 = vrcp.f32 %v1321_v60  ;;  %v1333_v57 = vand.u32 2147483648, %v1321_v60  ;;  %vm1327_vm13 = vweird.f32 %v1321_v60  ;;  %v1331_v63 = vand.u32 2147483647, %v1321_v60 }
0x2032   :  { %v1458_v50 = vpop.f32.mrf.mxu2  ;;  %v1334_v4 = vor.u32 1.1754944e-38, %v1333_v57  ;;  %vm1332_vm15 = vcmp.eq.f32.partialorder %v1331_v63, 8.507059e+37 }
0x2033   :  { %v1459_v21 = vadd.f32 %v2219_v38, %v1458_v50 }
0x2035   :  { %1480 = vst [vmem:[%s2291_s13 + $0x8] sm:$0xff] %v1459_v21 }
0x2036   :  { %v1670_v51 = vpop.eup %1669 }
0x2037   :  { %v1323_v61 = vmul.f32 %v1670_v51, %v1321_v60  ;;  %vm1328_vm12 = vweird.f32 %v1670_v51 }
0x2038   :  { %vm1329_vm14 = vmor %vm1327_vm13, %vm1328_vm12 }
0x2039   :  { %v1324_v53 = vsub.f32 1.0, %v1323_v61 }
0x203a   :  { %v1461_v44 = vpop.f32.mrf.mxu2 }
0x203b   :  { %v1462_v45 = vadd.f32 %v2219_v38, %v1461_v44  ;;  %v1325_v55 = vmul.f32 %v1670_v51, %v1324_v53 }
0x203d   :  { %1481 = vst [vmem:[%s2291_s13 + $0x10] sm:$0xff] %v1462_v45  ;;  %v1326_v62 = vadd.f32 %v1670_v51, %v1325_v55 }
0x203f   :  { %v1330_v0 = vsel %vm1329_vm14, %v1670_v51, %v1326_v62 }
0x2040   :  { %v1335_v10 = vsel %vm1332_vm15, %v1334_v4, %v1330_v0 }
0x2041   :  { %v1349_v17 = vsub.f32 1.0, %v1335_v10  ;;  %v1355_v30 = vmul.f32 %v1335_v10, %v2184_v32 }
0x2042   :  { %v1464_v46 = vpop.f32.mrf.mxu2 }
0x2043   :  { %v1465_v47 = vadd.f32 %v2219_v38, %v1464_v46 }
0x2045   :  { %1482 = vst [vmem:[%s2291_s13 + $0x18] sm:$0xff] %v1465_v47 }
0x204a   :  { %v1467_v48 = vpop.f32.mrf.mxu2 }
0x204b   :  { %v1468_v49 = vadd.f32 %v2219_v38, %v1467_v48 }
0x204d   :  { %1483 = vst [vmem:[%s2291_s13 + $0x20] sm:$0xff] %v1468_v49 }
0x2097   :  { %v1340_v6 = vpop.permute.xlu1 %1339 }
0x2098   :  { %v1342_v7 = vmul.f32 %v1340_v6, %v1335_v10 }
0x209a   :  { %1344 = vrot.lane.b32.xlu2 %v1342_v7, %s1680_s5 }
0x20a2   :  { %803 = vperm.xlu2 %1576, %v798_v3  }
0x20f4   :  { %v1345_v11 = vpop.permute.xlu2 %1344 }
0x20f5   :  { %v1347_v5 = vadd.f32 %v1345_v11, %v1291_v56 }
0x20f7   :  { %1671 = vtanh.f32 %v1347_v5 }
0x20fc   :  { %v804_v14 = vpop.permute.xlu2 %803 }
0x20fd   :  { %v1672_v15 = vpop.eup %1671  ;;  %vm812_vm0 = vcmp.eq.s32.totalorder %v804_v14, %v1867_v27 }
0x20fe   :  { %1351 = vrot.lane.b32.xlu0 %v1672_v15, %s1682_s4  ;;  %1542 = vmatmul.msk.f32.gmra.mxu1 %vm812_vm0, %v1681_v29 }
0x2170   :  { %v1352_v18 = vpop.permute.xlu0 %1351 }
0x2171   :  { %v1354_v19 = vmul.f32 %v1352_v18, %v1349_v17 }
0x2173   :  { %v1356_v34 = vadd.f32 %v1355_v30, %v1354_v19 }
0x2175   :  { %1359 = vrot.lane.b32.xlu1 %v1356_v34, %s1682_s4 }
0x217b   :  { %v887_v24 = vpop.f32.mrf.mxu1 }
0x217c   :  { %v888_v25 = vadd.f32 %v2091_v8, %v887_v24 }
0x21e7   :  { %v1360_v40 = vpop.permute.xlu1 %1359 }
0x21e8   :  { %1557 = vmatmul.msk.f32.vlgmr.msrb.gmra.mxu3 %vm195_vm6, %v1360_v40 }
0x21f0   :  { %1564 = vmatmul.msk.f32.vlgmr.msra.gmra.mxu3 %vm195_vm6, %v2200_v39 }
0x21f8   :  { %1565 = vmatmul.msk.f32.gmra.mxu3 %vm195_vm6, %v1360_v40 }
0x226b   :  { %v1380_v27 = vpop.f32.mrf.mxu3 }
0x226c   :  { %v1403_v13 = vadd.f32 %v1380_v27, %v2084_v1  ;;  %v1357_v1 = vadd.f32 %v888_v25, %v2093_v2 }
0x226e   :  { %1405 = vrot.lane.b32.xlu0 %v1403_v13, %s1680_s5  ;;  %v1383_v26 = vadd.f32 %v1380_v27, %v1357_v1 }
0x2270   :  { %v1558_v28 = vmul.f32 -1.442695, %v1383_v26 }
0x2272   :  { %1673 = vpow2.f32 %v1558_v28 }
0x2273   :  { %v1470_v29 = vpop.f32.mrf.mxu3 }
0x2274   :  { %v1471_v20 = vadd.f32 %v2219_v38, %v1470_v29 }
0x2276   :  { %1484 = vst [vmem:[%s2291_s13 + $0x28] sm:$0xff] %v1471_v20 }
0x2278   :  { %v1674_v31 = vpop.eup %1673 }
0x2279   :  { %v1387_v12 = vadd.f32 1.0, %v1674_v31 }
0x227b   :  { %v1473_v22 = vpop.f32.mrf.mxu3  ;;  %1675 = vrcp.f32 %v1387_v12  ;;  %v1399_v39 = vand.u32 2147483648, %v1387_v12  ;;  %vm1393_vm2 = vweird.f32 %v1387_v12  ;;  %v1397_v41 = vand.u32 2147483647, %v1387_v12 }
0x227c   :  { %v1474_v23 = vadd.f32 %v2219_v38, %v1473_v22 }
0x227d   :  { %v1400_v8 = vor.u32 1.1754944e-38, %v1399_v39  ;;  %vm1398_vm4 = vcmp.eq.f32.partialorder %v1397_v41, 8.507059e+37 }
0x227e   :  { %1485 = vst [vmem:[%s2291_s13 + $0x30] sm:$0xff] %v1474_v23 }
0x2281   :  { %v1676_v32 = vpop.eup %1675 }
0x2282   :  { %v1389_v33 = vmul.f32 %v1676_v32, %v1387_v12  ;;  %vm1394_vm1 = vweird.f32 %v1676_v32 }
0x2283   :  { %vm1395_vm3 = vmor %vm1393_vm2, %vm1394_vm1 }
0x2284   :  { %v1390_v35 = vsub.f32 1.0, %v1389_v33 }
0x2286   :  { %v1391_v36 = vmul.f32 %v1676_v32, %v1390_v35 }
0x2288   :  { %v1392_v37 = vadd.f32 %v1676_v32, %v1391_v36 }
0x228a   :  { %v1396_v42 = vsel %vm1395_vm3, %v1676_v32, %v1392_v37 }
0x228b   :  { %v1401_v16 = vsel %vm1398_vm4, %v1400_v8, %v1396_v42 }
0x228c   :  { %v1415_v45 = vsub.f32 1.0, %v1401_v16  ;;  %v1421_v47 = vmul.f32 %v1401_v16, %v1356_v34 }
0x22e0   :  { %v1406_v2 = vpop.permute.xlu0 %1405 }
0x22e1   :  { %v1408_v43 = vmul.f32 %v1406_v2, %v1401_v16 }
0x22e3   :  { %1410 = vrot.lane.b32.xlu1 %v1408_v43, %s1680_s5 }
0x2355   :  { %v1411_v50 = vpop.permute.xlu1 %1410 }
0x2356   :  { %v1413_v21 = vadd.f32 %v1411_v50, %v1357_v1 }
0x2358   :  { %1677 = vtanh.f32 %v1413_v21 }
0x235e   :  { %v1678_v44 = vpop.eup %1677 }
0x235f   :  { %1417 = vrot.lane.b32.xlu2 %v1678_v44, %s1682_s4 }
0x23b9   :  { %v1418_v46 = vpop.permute.xlu2 %1417 }
0x23ba   :  { %v1420_v48 = vmul.f32 %v1418_v46, %v1415_v45 }
0x23bc   :  { %v1422_v49 = vadd.f32 %v1421_v47, %v1420_v48 }
0x23be   :  { %1424 = vrot.lane.b32.xlu0 %v1422_v49, %s1682_s4 }
0x2430   :  { %v1425_v52 = vpop.permute.xlu0 %1424 }
0x2431   :  { %1427 = vst.msk [vmem:[%s2292_s14] sm:$0xff] %vm195_vm6, %v1425_v52  ;;  %1566 = vmatmul.msk.f32.gmra.mxu3 %vm195_vm6, %v1425_v52 }
0x24b4   :  { %v1476_v54 = vpop.f32.mrf.mxu3 }
0x24b5   :  { %v1477_v56 = vadd.f32 %v2219_v38, %v1476_v54 }
0x24b7   :  { %1486 = vst [vmem:[%s2291_s13 + $0x38] sm:$0xff] %v1477_v56 }

</bundles_post_ra>
